<compile_context>
chip_gen: v7x
topology: tpu7x:2x2x1
jax: 0.10.0
libtpu: 0.0.40
codegen_flags: <defaults>
</compile_context>

<pallas_src>
import functools

import jax
import jax.numpy as jnp
import numpy as np
from jax import lax
from jax.experimental import pallas as pl
from jax.experimental.pallas import tpu as pltpu


def _round_up(v, m):
    return (v + m - 1) // m * m


def _dqn_lstm_kernel(x_ref, h0_ref, c0_ref,
                     wih_ref, whh_ref, b_ref,
                     wlin_ref, blin_ref,
                     q_ref, h_out_ref, c_out_ref,
                     gx_ref):
    """LSTM recurrence + linear head for one batch block.

    x_ref    : (T, TB, Dp)   time-major input block (f32 or bf16)
    h0/c0    : (TB, Hp)      f32
    wih_ref  : (Dp, 4*Hp)    transposed, gate order [i,f,g,o], gate-padded
    whh_ref  : (Hp, 4*Hp)
    b_ref    : (1, 4*Hp)     fused bias (b_ih + b_hh), f32
    wlin_ref : (Hp, Ap)
    blin_ref : (1, Ap)       f32
    q_ref    : (TB, Ap)      f32 out
    h_out/c_out : (TB, Hp)   f32 out (aliased with h0/c0)
    gx_ref   : (T*TB, 4*Hp)  f32 VMEM scratch for the hoisted input projection
    """
    T, TB, Dp = x_ref.shape
    Hp = whh_ref.shape[0]

    # ---- Hoisted input projection + fused bias for ALL timesteps.
    # One big (T*TB, Dp) x (Dp, 4Hp) MXU call instead of T tiny matmuls and
    # T bias broadcasts on the serial critical path.
    x2 = x_ref[...].reshape(T * TB, Dp)
    gx_ref[...] = (
        jnp.dot(x2, wih_ref[...], preferred_element_type=jnp.float32)
        + b_ref[...]
    )

    whh = whh_ref[...]
    mm_dtype = whh.dtype  # bf16 on the fast path, f32 otherwise

    def step(t, carry):
        h, c = carry                                        # (TB, Hp) f32
        start = pl.multiple_of(t * TB, TB)
        g_x = gx_ref[pl.ds(start, TB), :]                   # per-step VMEM load
        gates = g_x + jnp.dot(h.astype(mm_dtype), whh,
                              preferred_element_type=jnp.float32)  # (TB, 4Hp)
        # Hp is a multiple of 128 -> each gate slab is lane-aligned.
        i_g = jax.nn.sigmoid(gates[:, 0 * Hp:1 * Hp])
        f_g = jax.nn.sigmoid(gates[:, 1 * Hp:2 * Hp])
        g_g = jnp.tanh(gates[:, 2 * Hp:3 * Hp])
        o_g = jax.nn.sigmoid(gates[:, 3 * Hp:4 * Hp])
        c_new = f_g * c + i_g * g_g
        h_new = o_g * jnp.tanh(c_new)
        return h_new, c_new

    # Short static trip count: fully unroll so MXU/EUP/VPU work from adjacent
    # timesteps can be co-issued by the scheduler.
    h, c = lax.fori_loop(0, T, step, (h0_ref[...], c0_ref[...]), unroll=True)

    # Q-values from the last-timestep hidden state (== lstm_out[:, -1, :]).
    q_ref[...] = (
        jnp.dot(h.astype(wlin_ref.dtype), wlin_ref[...],
                preferred_element_type=jnp.float32)
        + blin_ref[...]
    )
    h_out_ref[...] = h
    c_out_ref[...] = c


def _pad_gate_cols(w, hp):
    """Pad the trailing 4*H gate axis (PyTorch order [i,f,g,o]) to 4*Hp."""
    rows, four_h = w.shape
    h = four_h // 4
    w4 = w.reshape(rows, 4, h)
    w4 = jnp.pad(w4, ((0, 0), (0, 0), (0, hp - h)))
    return w4.reshape(rows, 4 * hp)


@functools.partial(jax.jit, static_argnames=("compute_dtype", "batch_block"))
def _forward_impl(x, h0, c0, wih, whh, b, wlin, blin, *,
                  compute_dtype, batch_block):
    assert batch_block % 8 == 0, "batch_block must be a multiple of 8"
    B, T, D = x.shape
    H = whh.shape[0]
    A = wlin.shape[1]

    Hp = _round_up(H, 128)
    Dp = _round_up(D, 128)
    Ap = _round_up(A, 128)
    TB = batch_block
    Bp = _round_up(B, TB)

    # --- Zero-pad to lane/sublane-aligned shapes. Zero padding keeps the
    #     first H/A lanes exact (padded whh/wih/wlin columns & rows are 0, so
    #     padded gate lanes = 0 -> padded c/h lanes stay 0 through the loop).
    x_p = jnp.transpose(x, (1, 0, 2))                              # time-major
    x_p = jnp.pad(x_p, ((0, 0), (0, Bp - B), (0, Dp - D))).astype(compute_dtype)
    h0_p = jnp.pad(h0, ((0, Bp - B), (0, Hp - H))).astype(jnp.float32)
    c0_p = jnp.pad(c0, ((0, Bp - B), (0, Hp - H))).astype(jnp.float32)

    wih_p = jnp.pad(_pad_gate_cols(wih, Hp),
                    ((0, Dp - D), (0, 0))).astype(compute_dtype)
    whh_p = jnp.pad(_pad_gate_cols(whh, Hp),
                    ((0, Hp - H), (0, 0))).astype(compute_dtype)
    b_p = _pad_gate_cols(b, Hp).astype(jnp.float32)                # (1, 4Hp)
    wlin_p = jnp.pad(wlin, ((0, Hp - H), (0, Ap - A))).astype(compute_dtype)
    blin_p = jnp.pad(blin, ((0, 0), (0, Ap - A))).astype(jnp.float32)

    n_blocks = Bp // TB

    q_p, h_p, c_p = pl.pallas_call(
        _dqn_lstm_kernel,
        out_shape=(
            jax.ShapeDtypeStruct((Bp, Ap), jnp.float32),
            jax.ShapeDtypeStruct((Bp, Hp), jnp.float32),
            jax.ShapeDtypeStruct((Bp, Hp), jnp.float32),
        ),
        grid=(n_blocks,),
        in_specs=[
            pl.BlockSpec((T, TB, Dp), lambda i: (0, i, 0)),   # x (time-major)
            pl.BlockSpec((TB, Hp), lambda i: (i, 0)),         # h0
            pl.BlockSpec((TB, Hp), lambda i: (i, 0)),         # c0
            pl.BlockSpec((Dp, 4 * Hp), lambda i: (0, 0)),     # W_ih (T)
            pl.BlockSpec((Hp, 4 * Hp), lambda i: (0, 0)),     # W_hh (T)
            pl.BlockSpec((1, 4 * Hp), lambda i: (0, 0)),      # fused bias
            pl.BlockSpec((Hp, Ap), lambda i: (0, 0)),         # W_lin (T)
            pl.BlockSpec((1, Ap), lambda i: (0, 0)),          # b_lin
        ],
        out_specs=(
            pl.BlockSpec((TB, Ap), lambda i: (i, 0)),         # q
            pl.BlockSpec((TB, Hp), lambda i: (i, 0)),         # h_out
            pl.BlockSpec((TB, Hp), lambda i: (i, 0)),         # c_out
        ),
        scratch_shapes=[pltpu.VMEM((T * TB, 4 * Hp), jnp.float32)],
        # h0 -> h_out, c0 -> c_out: no extra HBM round trips when callers
        # thread hidden state across decode steps.
        input_output_aliases={1: 1, 2: 2},
        compiler_params=pltpu.CompilerParams(
            dimension_semantics=("parallel",),
            vmem_limit_bytes=32 * 1024 * 1024,
        ),
    )(x_p, h0_p, c0_p, wih_p, whh_p, b_p, wlin_p, blin_p)

    return q_p[:B, :A], h_p[:B, :H], c_p[:B, :H]


def dqn_lstm_forward(x, params, hidden_state=None, *,
                     compute_dtype=jnp.float32, batch_block=8):
    """JAX wrapper matching DQNLSTM.forward(x, hidden_state).

    compute_dtype=jnp.bfloat16 enables the bf16-MXU fast path (v6e/v7x):
    weights and x feed the MXU in bf16 with f32 accumulation; h/c state and
    all gate nonlinearity math remain f32.
    """
    B, T, D = x.shape
    H = params["whh"].shape[0]
    if hidden_state is None:
        h0 = jnp.zeros((B, H), jnp.float32)
        c0 = jnp.zeros((B, H), jnp.float32)
    else:
        h0, c0 = hidden_state
        h0 = h0[0].astype(jnp.float32)
        c0 = c0[0].astype(jnp.float32)

    q, h_n, c_n = _forward_impl(
        x, h0, c0,
        params["wih"], params["whh"], params["b"],
        params["wlin"], params["blin"],
        compute_dtype=compute_dtype, batch_block=batch_block)

    # Return hidden state in PyTorch's (num_layers=1, B, H) convention.
    return q, (h_n[None, :, :], c_n[None, :, :])


def init_params(key, input_dim, hidden_size, num_actions):
    """Deterministic init mimicking PyTorch's U(-1/sqrt(H), 1/sqrt(H))."""
    ks = jax.random.split(key, 6)
    bound = 1.0 / np.sqrt(hidden_size)
    u = lambda k, shape: jax.random.uniform(
        k, shape, jnp.float32, minval=-bound, maxval=bound)
    # Stored transposed relative to PyTorch: (in, out) instead of (out, in).
    wih = u(ks[0], (input_dim, 4 * hidden_size))
    whh = u(ks[1], (hidden_size, 4 * hidden_size))
    b_ih = u(ks[2], (4 * hidden_size,))
    b_hh = u(ks[3], (4 * hidden_size,))
    wlin = u(ks[4], (hidden_size, num_actions))
    blin = u(ks[5], (num_actions,))
    return {
        "wih": wih,
        "whh": whh,
        "b": (b_ih + b_hh)[None, :],
        "wlin": wlin,
        "blin": blin[None, :],
    }


def _reference_forward(x, params):
    """Pure-JAX reference (same math, f32) for the correctness check."""
    B, T, D = x.shape
    H = params["whh"].shape[0]
    h = jnp.zeros((B, H), jnp.float32)
    c = jnp.zeros((B, H), jnp.float32)
    for t in range(T):
        gates = x[:, t, :] @ params["wih"] + h @ params["whh"] + params["b"]
        i_g = jax.nn.sigmoid(gates[:, 0 * H:1 * H])
        f_g = jax.nn.sigmoid(gates[:, 1 * H:2 * H])
        g_g = jnp.tanh(gates[:, 2 * H:3 * H])
        o_g = jax.nn.sigmoid(gates[:, 3 * H:4 * H])
        c = f_g * c + i_g * g_g
        h = o_g * jnp.tanh(c)
    q = h @ params["wlin"] + params["blin"]
    return q, h, c


if __name__ == "__main__":
    B, T, D, H, A = 2, 8, 16, 32, 4   # batch, seq, input_dim, hidden, actions

    key = jax.random.PRNGKey(0)
    k_x, k_p = jax.random.split(key)
    x = jax.random.normal(k_x, (B, T, D), jnp.float32)
    params = init_params(k_p, D, H, A)

    # ---- f32 path: strict numerical check against the pure-JAX reference.
    q, (h_n, c_n) = dqn_lstm_forward(x, params, hidden_state=None)
    jax.block_until_ready((q, h_n, c_n))
    assert q.shape == (B, A)
    assert h_n.shape == (1, B, H) and c_n.shape == (1, B, H)

    q_ref, h_ref, c_ref = _reference_forward(x, params)
    np.testing.assert_allclose(np.asarray(q), np.asarray(q_ref), rtol=1e-5, atol=1e-5)
    np.testing.assert_allclose(np.asarray(h_n[0]), np.asarray(h_ref), rtol=1e-5, atol=1e-5)
    np.testing.assert_allclose(np.asarray(c_n[0]), np.asarray(c_ref), rtol=1e-5, atol=1e-5)

    # ---- bf16-weights fast path (v6e/v7x): loose tolerance vs f32 reference.
    q_bf, (h_bf, c_bf) = dqn_lstm_forward(x, params, compute_dtype=jnp.bfloat16)
    jax.block_until_ready((q_bf, h_bf, c_bf))
    np.testing.assert_allclose(np.asarray(q_bf), np.asarray(q_ref), rtol=0.03, atol=0.03)

    # ---- Thread hidden state across a second call (exercises the aliased
    #      h0/c0 -> h_out/c_out path used by recurrent decode loops).
    q2, (h2, c2) = dqn_lstm_forward(x, params, hidden_state=(h_n, c_n))
    jax.block_until_ready((q2, h2, c2))
    assert q2.shape == (B, A)

    print("KERNEL_OK")
</pallas_src>

<mosaic_0001>
module attributes {stable_mosaic.version = 11 : i64} {
  func.func @_dqn_lstm_kernel(%arg0: i32, %arg1: memref<8x8x128xf32, #tpu.memory_space<vmem>>, %arg2: memref<8x128xf32, #tpu.memory_space<vmem>>, %arg3: memref<8x128xf32, #tpu.memory_space<vmem>>, %arg4: memref<128x512xf32, #tpu.memory_space<vmem>>, %arg5: memref<128x512xf32, #tpu.memory_space<vmem>>, %arg6: memref<1x512xf32, #tpu.memory_space<vmem>>, %arg7: memref<128x128xf32, #tpu.memory_space<vmem>>, %arg8: memref<1x128xf32, #tpu.memory_space<vmem>>, %arg9: memref<8x128xf32, #tpu.memory_space<vmem>>, %arg10: memref<8x128xf32, #tpu.memory_space<vmem>>, %arg11: memref<8x128xf32, #tpu.memory_space<vmem>>, %arg12: memref<64x512xf32, #tpu.memory_space<vmem>>) attributes {dimension_semantics = [#tpu.dimension_semantics<parallel>], iteration_bounds = array<i64: 1>, scalar_prefetch = 0 : i64, scratch_operands = 1 : i64, tpu.core_type = #tpu.core_type<tc>, window_params = [{transform_indices = @transform_0, window_bounds = array<i64: 8, 8, 128>}, {transform_indices = @transform_1, window_bounds = array<i64: 8, 128>}, {transform_indices = @transform_2, window_bounds = array<i64: 8, 128>}, {pipeline_mode = #tpu.pipeline_mode<synchronous>, transform_indices = @transform_3, window_bounds = array<i64: 128, 512>}, {pipeline_mode = #tpu.pipeline_mode<synchronous>, transform_indices = @transform_4, window_bounds = array<i64: 128, 512>}, {pipeline_mode = #tpu.pipeline_mode<synchronous>, transform_indices = @transform_5, window_bounds = array<i64: 1, 512>}, {pipeline_mode = #tpu.pipeline_mode<synchronous>, transform_indices = @transform_6, window_bounds = array<i64: 128, 128>}, {pipeline_mode = #tpu.pipeline_mode<synchronous>, transform_indices = @transform_7, window_bounds = array<i64: 1, 128>}, {transform_indices = @transform_8, window_bounds = array<i64: 8, 128>}, {transform_indices = @transform_9, window_bounds = array<i64: 8, 128>}, {transform_indices = @transform_10, window_bounds = array<i64: 8, 128>}]} {
    %c0 = arith.constant 0 : index
    %c0_0 = arith.constant 0 : index
    %c0_1 = arith.constant 0 : index
    %0 = vector.load %arg1[%c0, %c0_0, %c0_1] : memref<8x8x128xf32, #tpu.memory_space<vmem>>, vector<8x8x128xf32>
    %1 = vector.shape_cast %0 : vector<8x8x128xf32> to vector<64x128xf32>
    %c0_2 = arith.constant 0 : index
    %c0_3 = arith.constant 0 : index
    %2 = vector.load %arg4[%c0_2, %c0_3] : memref<128x512xf32, #tpu.memory_space<vmem>>, vector<128x512xf32>
    %cst = arith.constant dense<0.000000e+00> : vector<64x512xf32>
    %3 = tpu.matmul %1, %2, %cst {dimension_numbers = #tpu.dot_dimension_numbers<[1], [0], [0], [1], [0, 0, 1, 1], [], []>} : vector<64x128xf32>, vector<128x512xf32>, vector<64x512xf32> -> vector<64x512xf32>
    %c0_4 = arith.constant 0 : index
    %c0_5 = arith.constant 0 : index
    %4 = vector.load %arg6[%c0_4, %c0_5] : memref<1x512xf32, #tpu.memory_space<vmem>>, vector<1x512xf32>
    %5 = vector.broadcast %4 : vector<1x512xf32> to vector<64x512xf32>
    %6 = arith.addf %3, %5 : vector<64x512xf32>
    %c0_6 = arith.constant 0 : index
    %c0_7 = arith.constant 0 : index
    %7 = vector.load %arg12[%c0_6, %c0_7] : memref<64x512xf32, #tpu.memory_space<vmem>>, vector<64x512xf32>
    tpu.vector_store %arg12[%c0_6, %c0_7], %6 {strides = array<i32>} : memref<64x512xf32, #tpu.memory_space<vmem>>, vector<64x512xf32>,
    %c0_8 = arith.constant 0 : index
    %c0_9 = arith.constant 0 : index
    %8 = vector.load %arg5[%c0_8, %c0_9] : memref<128x512xf32, #tpu.memory_space<vmem>>, vector<128x512xf32>
    %c0_10 = arith.constant 0 : index
    %c0_11 = arith.constant 0 : index
    %9 = vector.load %arg2[%c0_10, %c0_11] : memref<8x128xf32, #tpu.memory_space<vmem>>, vector<8x128xf32>
    %c0_12 = arith.constant 0 : index
    %c0_13 = arith.constant 0 : index
    %10 = vector.load %arg3[%c0_12, %c0_13] : memref<8x128xf32, #tpu.memory_space<vmem>>, vector<8x128xf32>
    %c0_i32 = arith.constant 0 : i32
    %c8_i32 = arith.constant 8 : i32
    %11 = arith.muli %c0_i32, %c8_i32 : i32
    %12 = tpu.assume_multiple %11, 8 : i32
    %13 = arith.index_cast %12 : i32 to index
    %c0_14 = arith.constant 0 : index
    %14 = vector.load %arg12[%13, %c0_14] : memref<64x512xf32, #tpu.memory_space<vmem>>, vector<8x512xf32>
    %cst_15 = arith.constant dense<0.000000e+00> : vector<8x512xf32>
    %15 = tpu.matmul %9, %8, %cst_15 {dimension_numbers = #tpu.dot_dimension_numbers<[1], [0], [0], [1], [0, 0, 1, 1], [], []>} : vector<8x128xf32>, vector<128x512xf32>, vector<8x512xf32> -> vector<8x512xf32>
    %16 = arith.addf %14, %15 : vector<8x512xf32>
    %17 = vector.extract_strided_slice %16 {offsets = [0, 0], sizes = [8, 128], strides = [1, 1]} : vector<8x512xf32> to vector<8x128xf32>
    %18 = arith.negf %17 : vector<8x128xf32>
    %19 = math.exp %18 : vector<8x128xf32>
    %cst_16 = arith.constant 1.000000e+00 : f32
    %20 = vector.broadcast %cst_16 : f32 to vector<8x128xf32>
    %21 = arith.addf %20, %19 : vector<8x128xf32>
    %22 = arith.divf %20, %21 : vector<8x128xf32>
    %23 = vector.extract_strided_slice %16 {offsets = [0, 128], sizes = [8, 128], strides = [1, 1]} : vector<8x512xf32> to vector<8x128xf32>
    %24 = arith.negf %23 : vector<8x128xf32>
    %25 = math.exp %24 : vector<8x128xf32>
    %cst_17 = arith.constant 1.000000e+00 : f32
    %26 = vector.broadcast %cst_17 : f32 to vector<8x128xf32>
    %27 = arith.addf %26, %25 : vector<8x128xf32>
    %28 = arith.divf %26, %27 : vector<8x128xf32>
    %29 = vector.extract_strided_slice %16 {offsets = [0, 256], sizes = [8, 128], strides = [1, 1]} : vector<8x512xf32> to vector<8x128xf32>
    %30 = math.tanh %29 : vector<8x128xf32>
    %31 = vector.extract_strided_slice %16 {offsets = [0, 384], sizes = [8, 128], strides = [1, 1]} : vector<8x512xf32> to vector<8x128xf32>
    %32 = arith.negf %31 : vector<8x128xf32>
    %33 = math.exp %32 : vector<8x128xf32>
    %cst_18 = arith.constant 1.000000e+00 : f32
    %34 = vector.broadcast %cst_18 : f32 to vector<8x128xf32>
    %35 = arith.addf %34, %33 : vector<8x128xf32>
    %36 = arith.divf %34, %35 : vector<8x128xf32>
    %37 = arith.mulf %28, %10 : vector<8x128xf32>
    %38 = arith.mulf %22, %30 : vector<8x128xf32>
    %39 = arith.addf %37, %38 : vector<8x128xf32>
    %40 = math.tanh %39 : vector<8x128xf32>
    %41 = arith.mulf %36, %40 : vector<8x128xf32>
    %c1_i32 = arith.constant 1 : i32
    %c8_i32_19 = arith.constant 8 : i32
    %42 = arith.muli %c1_i32, %c8_i32_19 : i32
    %43 = tpu.assume_multiple %42, 8 : i32
    %44 = arith.index_cast %43 : i32 to index
    %c0_20 = arith.constant 0 : index
    %45 = vector.load %arg12[%44, %c0_20] : memref<64x512xf32, #tpu.memory_space<vmem>>, vector<8x512xf32>
    %cst_21 = arith.constant dense<0.000000e+00> : vector<8x512xf32>
    %46 = tpu.matmul %41, %8, %cst_21 {dimension_numbers = #tpu.dot_dimension_numbers<[1], [0], [0], [1], [0, 0, 1, 1], [], []>} : vector<8x128xf32>, vector<128x512xf32>, vector<8x512xf32> -> vector<8x512xf32>
    %47 = arith.addf %45, %46 : vector<8x512xf32>
    %48 = vector.extract_strided_slice %47 {offsets = [0, 0], sizes = [8, 128], strides = [1, 1]} : vector<8x512xf32> to vector<8x128xf32>
    %49 = arith.negf %48 : vector<8x128xf32>
    %50 = math.exp %49 : vector<8x128xf32>
    %cst_22 = arith.constant 1.000000e+00 : f32
    %51 = vector.broadcast %cst_22 : f32 to vector<8x128xf32>
    %52 = arith.addf %51, %50 : vector<8x128xf32>
    %53 = arith.divf %51, %52 : vector<8x128xf32>
    %54 = vector.extract_strided_slice %47 {offsets = [0, 128], sizes = [8, 128], strides = [1, 1]} : vector<8x512xf32> to vector<8x128xf32>
    %55 = arith.negf %54 : vector<8x128xf32>
    %56 = math.exp %55 : vector<8x128xf32>
    %cst_23 = arith.constant 1.000000e+00 : f32
    %57 = vector.broadcast %cst_23 : f32 to vector<8x128xf32>
    %58 = arith.addf %57, %56 : vector<8x128xf32>
    %59 = arith.divf %57, %58 : vector<8x128xf32>
    %60 = vector.extract_strided_slice %47 {offsets = [0, 256], sizes = [8, 128], strides = [1, 1]} : vector<8x512xf32> to vector<8x128xf32>
    %61 = math.tanh %60 : vector<8x128xf32>
    %62 = vector.extract_strided_slice %47 {offsets = [0, 384], sizes = [8, 128], strides = [1, 1]} : vector<8x512xf32> to vector<8x128xf32>
    %63 = arith.negf %62 : vector<8x128xf32>
    %64 = math.exp %63 : vector<8x128xf32>
    %cst_24 = arith.constant 1.000000e+00 : f32
    %65 = vector.broadcast %cst_24 : f32 to vector<8x128xf32>
    %66 = arith.addf %65, %64 : vector<8x128xf32>
    %67 = arith.divf %65, %66 : vector<8x128xf32>
    %68 = arith.mulf %59, %39 : vector<8x128xf32>
    %69 = arith.mulf %53, %61 : vector<8x128xf32>
    %70 = arith.addf %68, %69 : vector<8x128xf32>
    %71 = math.tanh %70 : vector<8x128xf32>
    %72 = arith.mulf %67, %71 : vector<8x128xf32>
    %c2_i32 = arith.constant 2 : i32
    %c8_i32_25 = arith.constant 8 : i32
    %73 = arith.muli %c2_i32, %c8_i32_25 : i32
    %74 = tpu.assume_multiple %73, 8 : i32
    %75 = arith.index_cast %74 : i32 to index
    %c0_26 = arith.constant 0 : index
    %76 = vector.load %arg12[%75, %c0_26] : memref<64x512xf32, #tpu.memory_space<vmem>>, vector<8x512xf32>
    %cst_27 = arith.constant dense<0.000000e+00> : vector<8x512xf32>
    %77 = tpu.matmul %72, %8, %cst_27 {dimension_numbers = #tpu.dot_dimension_numbers<[1], [0], [0], [1], [0, 0, 1, 1], [], []>} : vector<8x128xf32>, vector<128x512xf32>, vector<8x512xf32> -> vector<8x512xf32>
    %78 = arith.addf %76, %77 : vector<8x512xf32>
    %79 = vector.extract_strided_slice %78 {offsets = [0, 0], sizes = [8, 128], strides = [1, 1]} : vector<8x512xf32> to vector<8x128xf32>
    %80 = arith.negf %79 : vector<8x128xf32>
    %81 = math.exp %80 : vector<8x128xf32>
    %cst_28 = arith.constant 1.000000e+00 : f32
    %82 = vector.broadcast %cst_28 : f32 to vector<8x128xf32>
    %83 = arith.addf %82, %81 : vector<8x128xf32>
    %84 = arith.divf %82, %83 : vector<8x128xf32>
    %85 = vector.extract_strided_slice %78 {offsets = [0, 128], sizes = [8, 128], strides = [1, 1]} : vector<8x512xf32> to vector<8x128xf32>
    %86 = arith.negf %85 : vector<8x128xf32>
    %87 = math.exp %86 : vector<8x128xf32>
    %cst_29 = arith.constant 1.000000e+00 : f32
    %88 = vector.broadcast %cst_29 : f32 to vector<8x128xf32>
    %89 = arith.addf %88, %87 : vector<8x128xf32>
    %90 = arith.divf %88, %89 : vector<8x128xf32>
    %91 = vector.extract_strided_slice %78 {offsets = [0, 256], sizes = [8, 128], strides = [1, 1]} : vector<8x512xf32> to vector<8x128xf32>
    %92 = math.tanh %91 : vector<8x128xf32>
    %93 = vector.extract_strided_slice %78 {offsets = [0, 384], sizes = [8, 128], strides = [1, 1]} : vector<8x512xf32> to vector<8x128xf32>
    %94 = arith.negf %93 : vector<8x128xf32>
    %95 = math.exp %94 : vector<8x128xf32>
    %cst_30 = arith.constant 1.000000e+00 : f32
    %96 = vector.broadcast %cst_30 : f32 to vector<8x128xf32>
    %97 = arith.addf %96, %95 : vector<8x128xf32>
    %98 = arith.divf %96, %97 : vector<8x128xf32>
    %99 = arith.mulf %90, %70 : vector<8x128xf32>
    %100 = arith.mulf %84, %92 : vector<8x128xf32>
    %101 = arith.addf %99, %100 : vector<8x128xf32>
    %102 = math.tanh %101 : vector<8x128xf32>
    %103 = arith.mulf %98, %102 : vector<8x128xf32>
    %c3_i32 = arith.constant 3 : i32
    %c8_i32_31 = arith.constant 8 : i32
    %104 = arith.muli %c3_i32, %c8_i32_31 : i32
    %105 = tpu.assume_multiple %104, 8 : i32
    %106 = arith.index_cast %105 : i32 to index
    %c0_32 = arith.constant 0 : index
    %107 = vector.load %arg12[%106, %c0_32] : memref<64x512xf32, #tpu.memory_space<vmem>>, vector<8x512xf32>
    %cst_33 = arith.constant dense<0.000000e+00> : vector<8x512xf32>
    %108 = tpu.matmul %103, %8, %cst_33 {dimension_numbers = #tpu.dot_dimension_numbers<[1], [0], [0], [1], [0, 0, 1, 1], [], []>} : vector<8x128xf32>, vector<128x512xf32>, vector<8x512xf32> -> vector<8x512xf32>
    %109 = arith.addf %107, %108 : vector<8x512xf32>
    %110 = vector.extract_strided_slice %109 {offsets = [0, 0], sizes = [8, 128], strides = [1, 1]} : vector<8x512xf32> to vector<8x128xf32>
    %111 = arith.negf %110 : vector<8x128xf32>
    %112 = math.exp %111 : vector<8x128xf32>
    %cst_34 = arith.constant 1.000000e+00 : f32
    %113 = vector.broadcast %cst_34 : f32 to vector<8x128xf32>
    %114 = arith.addf %113, %112 : vector<8x128xf32>
    %115 = arith.divf %113, %114 : vector<8x128xf32>
    %116 = vector.extract_strided_slice %109 {offsets = [0, 128], sizes = [8, 128], strides = [1, 1]} : vector<8x512xf32> to vector<8x128xf32>
    %117 = arith.negf %116 : vector<8x128xf32>
    %118 = math.exp %117 : vector<8x128xf32>
    %cst_35 = arith.constant 1.000000e+00 : f32
    %119 = vector.broadcast %cst_35 : f32 to vector<8x128xf32>
    %120 = arith.addf %119, %118 : vector<8x128xf32>
    %121 = arith.divf %119, %120 : vector<8x128xf32>
    %122 = vector.extract_strided_slice %109 {offsets = [0, 256], sizes = [8, 128], strides = [1, 1]} : vector<8x512xf32> to vector<8x128xf32>
    %123 = math.tanh %122 : vector<8x128xf32>
    %124 = vector.extract_strided_slice %109 {offsets = [0, 384], sizes = [8, 128], strides = [1, 1]} : vector<8x512xf32> to vector<8x128xf32>
    %125 = arith.negf %124 : vector<8x128xf32>
    %126 = math.exp %125 : vector<8x128xf32>
    %cst_36 = arith.constant 1.000000e+00 : f32
    %127 = vector.broadcast %cst_36 : f32 to vector<8x128xf32>
    %128 = arith.addf %127, %126 : vector<8x128xf32>
    %129 = arith.divf %127, %128 : vector<8x128xf32>
    %130 = arith.mulf %121, %101 : vector<8x128xf32>
    %131 = arith.mulf %115, %123 : vector<8x128xf32>
    %132 = arith.addf %130, %131 : vector<8x128xf32>
    %133 = math.tanh %132 : vector<8x128xf32>
    %134 = arith.mulf %129, %133 : vector<8x128xf32>
    %c4_i32 = arith.constant 4 : i32
    %c8_i32_37 = arith.constant 8 : i32
    %135 = arith.muli %c4_i32, %c8_i32_37 : i32
    %136 = tpu.assume_multiple %135, 8 : i32
    %137 = arith.index_cast %136 : i32 to index
    %c0_38 = arith.constant 0 : index
    %138 = vector.load %arg12[%137, %c0_38] : memref<64x512xf32, #tpu.memory_space<vmem>>, vector<8x512xf32>
    %cst_39 = arith.constant dense<0.000000e+00> : vector<8x512xf32>
    %139 = tpu.matmul %134, %8, %cst_39 {dimension_numbers = #tpu.dot_dimension_numbers<[1], [0], [0], [1], [0, 0, 1, 1], [], []>} : vector<8x128xf32>, vector<128x512xf32>, vector<8x512xf32> -> vector<8x512xf32>
    %140 = arith.addf %138, %139 : vector<8x512xf32>
    %141 = vector.extract_strided_slice %140 {offsets = [0, 0], sizes = [8, 128], strides = [1, 1]} : vector<8x512xf32> to vector<8x128xf32>
    %142 = arith.negf %141 : vector<8x128xf32>
    %143 = math.exp %142 : vector<8x128xf32>
    %cst_40 = arith.constant 1.000000e+00 : f32
    %144 = vector.broadcast %cst_40 : f32 to vector<8x128xf32>
    %145 = arith.addf %144, %143 : vector<8x128xf32>
    %146 = arith.divf %144, %145 : vector<8x128xf32>
    %147 = vector.extract_strided_slice %140 {offsets = [0, 128], sizes = [8, 128], strides = [1, 1]} : vector<8x512xf32> to vector<8x128xf32>
    %148 = arith.negf %147 : vector<8x128xf32>
    %149 = math.exp %148 : vector<8x128xf32>
    %cst_41 = arith.constant 1.000000e+00 : f32
    %150 = vector.broadcast %cst_41 : f32 to vector<8x128xf32>
    %151 = arith.addf %150, %149 : vector<8x128xf32>
    %152 = arith.divf %150, %151 : vector<8x128xf32>
    %153 = vector.extract_strided_slice %140 {offsets = [0, 256], sizes = [8, 128], strides = [1, 1]} : vector<8x512xf32> to vector<8x128xf32>
    %154 = math.tanh %153 : vector<8x128xf32>
    %155 = vector.extract_strided_slice %140 {offsets = [0, 384], sizes = [8, 128], strides = [1, 1]} : vector<8x512xf32> to vector<8x128xf32>
    %156 = arith.negf %155 : vector<8x128xf32>
    %157 = math.exp %156 : vector<8x128xf32>
    %cst_42 = arith.constant 1.000000e+00 : f32
    %158 = vector.broadcast %cst_42 : f32 to vector<8x128xf32>
    %159 = arith.addf %158, %157 : vector<8x128xf32>
    %160 = arith.divf %158, %159 : vector<8x128xf32>
    %161 = arith.mulf %152, %132 : vector<8x128xf32>
    %162 = arith.mulf %146, %154 : vector<8x128xf32>
    %163 = arith.addf %161, %162 : vector<8x128xf32>
    %164 = math.tanh %163 : vector<8x128xf32>
    %165 = arith.mulf %160, %164 : vector<8x128xf32>
    %c5_i32 = arith.constant 5 : i32
    %c8_i32_43 = arith.constant 8 : i32
    %166 = arith.muli %c5_i32, %c8_i32_43 : i32
    %167 = tpu.assume_multiple %166, 8 : i32
    %168 = arith.index_cast %167 : i32 to index
    %c0_44 = arith.constant 0 : index
    %169 = vector.load %arg12[%168, %c0_44] : memref<64x512xf32, #tpu.memory_space<vmem>>, vector<8x512xf32>
    %cst_45 = arith.constant dense<0.000000e+00> : vector<8x512xf32>
    %170 = tpu.matmul %165, %8, %cst_45 {dimension_numbers = #tpu.dot_dimension_numbers<[1], [0], [0], [1], [0, 0, 1, 1], [], []>} : vector<8x128xf32>, vector<128x512xf32>, vector<8x512xf32> -> vector<8x512xf32>
    %171 = arith.addf %169, %170 : vector<8x512xf32>
    %172 = vector.extract_strided_slice %171 {offsets = [0, 0], sizes = [8, 128], strides = [1, 1]} : vector<8x512xf32> to vector<8x128xf32>
    %173 = arith.negf %172 : vector<8x128xf32>
    %174 = math.exp %173 : vector<8x128xf32>
    %cst_46 = arith.constant 1.000000e+00 : f32
    %175 = vector.broadcast %cst_46 : f32 to vector<8x128xf32>
    %176 = arith.addf %175, %174 : vector<8x128xf32>
    %177 = arith.divf %175, %176 : vector<8x128xf32>
    %178 = vector.extract_strided_slice %171 {offsets = [0, 128], sizes = [8, 128], strides = [1, 1]} : vector<8x512xf32> to vector<8x128xf32>
    %179 = arith.negf %178 : vector<8x128xf32>
    %180 = math.exp %179 : vector<8x128xf32>
    %cst_47 = arith.constant 1.000000e+00 : f32
    %181 = vector.broadcast %cst_47 : f32 to vector<8x128xf32>
    %182 = arith.addf %181, %180 : vector<8x128xf32>
    %183 = arith.divf %181, %182 : vector<8x128xf32>
    %184 = vector.extract_strided_slice %171 {offsets = [0, 256], sizes = [8, 128], strides = [1, 1]} : vector<8x512xf32> to vector<8x128xf32>
    %185 = math.tanh %184 : vector<8x128xf32>
    %186 = vector.extract_strided_slice %171 {offsets = [0, 384], sizes = [8, 128], strides = [1, 1]} : vector<8x512xf32> to vector<8x128xf32>
    %187 = arith.negf %186 : vector<8x128xf32>
    %188 = math.exp %187 : vector<8x128xf32>
    %cst_48 = arith.constant 1.000000e+00 : f32
    %189 = vector.broadcast %cst_48 : f32 to vector<8x128xf32>
    %190 = arith.addf %189, %188 : vector<8x128xf32>
    %191 = arith.divf %189, %190 : vector<8x128xf32>
    %192 = arith.mulf %183, %163 : vector<8x128xf32>
    %193 = arith.mulf %177, %185 : vector<8x128xf32>
    %194 = arith.addf %192, %193 : vector<8x128xf32>
    %195 = math.tanh %194 : vector<8x128xf32>
    %196 = arith.mulf %191, %195 : vector<8x128xf32>
    %c6_i32 = arith.constant 6 : i32
    %c8_i32_49 = arith.constant 8 : i32
    %197 = arith.muli %c6_i32, %c8_i32_49 : i32
    %198 = tpu.assume_multiple %197, 8 : i32
    %199 = arith.index_cast %198 : i32 to index
    %c0_50 = arith.constant 0 : index
    %200 = vector.load %arg12[%199, %c0_50] : memref<64x512xf32, #tpu.memory_space<vmem>>, vector<8x512xf32>
    %cst_51 = arith.constant dense<0.000000e+00> : vector<8x512xf32>
    %201 = tpu.matmul %196, %8, %cst_51 {dimension_numbers = #tpu.dot_dimension_numbers<[1], [0], [0], [1], [0, 0, 1, 1], [], []>} : vector<8x128xf32>, vector<128x512xf32>, vector<8x512xf32> -> vector<8x512xf32>
    %202 = arith.addf %200, %201 : vector<8x512xf32>
    %203 = vector.extract_strided_slice %202 {offsets = [0, 0], sizes = [8, 128], strides = [1, 1]} : vector<8x512xf32> to vector<8x128xf32>
    %204 = arith.negf %203 : vector<8x128xf32>
    %205 = math.exp %204 : vector<8x128xf32>
    %cst_52 = arith.constant 1.000000e+00 : f32
    %206 = vector.broadcast %cst_52 : f32 to vector<8x128xf32>
    %207 = arith.addf %206, %205 : vector<8x128xf32>
    %208 = arith.divf %206, %207 : vector<8x128xf32>
    %209 = vector.extract_strided_slice %202 {offsets = [0, 128], sizes = [8, 128], strides = [1, 1]} : vector<8x512xf32> to vector<8x128xf32>
    %210 = arith.negf %209 : vector<8x128xf32>
    %211 = math.exp %210 : vector<8x128xf32>
    %cst_53 = arith.constant 1.000000e+00 : f32
    %212 = vector.broadcast %cst_53 : f32 to vector<8x128xf32>
    %213 = arith.addf %212, %211 : vector<8x128xf32>
    %214 = arith.divf %212, %213 : vector<8x128xf32>
    %215 = vector.extract_strided_slice %202 {offsets = [0, 256], sizes = [8, 128], strides = [1, 1]} : vector<8x512xf32> to vector<8x128xf32>
    %216 = math.tanh %215 : vector<8x128xf32>
    %217 = vector.extract_strided_slice %202 {offsets = [0, 384], sizes = [8, 128], strides = [1, 1]} : vector<8x512xf32> to vector<8x128xf32>
    %218 = arith.negf %217 : vector<8x128xf32>
    %219 = math.exp %218 : vector<8x128xf32>
    %cst_54 = arith.constant 1.000000e+00 : f32
    %220 = vector.broadcast %cst_54 : f32 to vector<8x128xf32>
    %221 = arith.addf %220, %219 : vector<8x128xf32>
    %222 = arith.divf %220, %221 : vector<8x128xf32>
    %223 = arith.mulf %214, %194 : vector<8x128xf32>
    %224 = arith.mulf %208, %216 : vector<8x128xf32>
    %225 = arith.addf %223, %224 : vector<8x128xf32>
    %226 = math.tanh %225 : vector<8x128xf32>
    %227 = arith.mulf %222, %226 : vector<8x128xf32>
    %c7_i32 = arith.constant 7 : i32
    %c8_i32_55 = arith.constant 8 : i32
    %228 = arith.muli %c7_i32, %c8_i32_55 : i32
    %229 = tpu.assume_multiple %228, 8 : i32
    %230 = arith.index_cast %229 : i32 to index
    %c0_56 = arith.constant 0 : index
    %231 = vector.load %arg12[%230, %c0_56] : memref<64x512xf32, #tpu.memory_space<vmem>>, vector<8x512xf32>
    %cst_57 = arith.constant dense<0.000000e+00> : vector<8x512xf32>
    %232 = tpu.matmul %227, %8, %cst_57 {dimension_numbers = #tpu.dot_dimension_numbers<[1], [0], [0], [1], [0, 0, 1, 1], [], []>} : vector<8x128xf32>, vector<128x512xf32>, vector<8x512xf32> -> vector<8x512xf32>
    %233 = arith.addf %231, %232 : vector<8x512xf32>
    %234 = vector.extract_strided_slice %233 {offsets = [0, 0], sizes = [8, 128], strides = [1, 1]} : vector<8x512xf32> to vector<8x128xf32>
    %235 = arith.negf %234 : vector<8x128xf32>
    %236 = math.exp %235 : vector<8x128xf32>
    %cst_58 = arith.constant 1.000000e+00 : f32
    %237 = vector.broadcast %cst_58 : f32 to vector<8x128xf32>
    %238 = arith.addf %237, %236 : vector<8x128xf32>
    %239 = arith.divf %237, %238 : vector<8x128xf32>
    %240 = vector.extract_strided_slice %233 {offsets = [0, 128], sizes = [8, 128], strides = [1, 1]} : vector<8x512xf32> to vector<8x128xf32>
    %241 = arith.negf %240 : vector<8x128xf32>
    %242 = math.exp %241 : vector<8x128xf32>
    %cst_59 = arith.constant 1.000000e+00 : f32
    %243 = vector.broadcast %cst_59 : f32 to vector<8x128xf32>
    %244 = arith.addf %243, %242 : vector<8x128xf32>
    %245 = arith.divf %243, %244 : vector<8x128xf32>
    %246 = vector.extract_strided_slice %233 {offsets = [0, 256], sizes = [8, 128], strides = [1, 1]} : vector<8x512xf32> to vector<8x128xf32>
    %247 = math.tanh %246 : vector<8x128xf32>
    %248 = vector.extract_strided_slice %233 {offsets = [0, 384], sizes = [8, 128], strides = [1, 1]} : vector<8x512xf32> to vector<8x128xf32>
    %249 = arith.negf %248 : vector<8x128xf32>
    %250 = math.exp %249 : vector<8x128xf32>
    %cst_60 = arith.constant 1.000000e+00 : f32
    %251 = vector.broadcast %cst_60 : f32 to vector<8x128xf32>
    %252 = arith.addf %251, %250 : vector<8x128xf32>
    %253 = arith.divf %251, %252 : vector<8x128xf32>
    %254 = arith.mulf %245, %225 : vector<8x128xf32>
    %255 = arith.mulf %239, %247 : vector<8x128xf32>
    %256 = arith.addf %254, %255 : vector<8x128xf32>
    %257 = math.tanh %256 : vector<8x128xf32>
    %258 = arith.mulf %253, %257 : vector<8x128xf32>
    %c8_i32_61 = arith.constant 8 : i32
    %c0_62 = arith.constant 0 : index
    %c0_63 = arith.constant 0 : index
    %259 = vector.load %arg7[%c0_62, %c0_63] : memref<128x128xf32, #tpu.memory_space<vmem>>, vector<128x128xf32>
    %cst_64 = arith.constant dense<0.000000e+00> : vector<8x128xf32>
    %260 = tpu.matmul %258, %259, %cst_64 {dimension_numbers = #tpu.dot_dimension_numbers<[1], [0], [0], [1], [0, 0, 1, 1], [], []>} : vector<8x128xf32>, vector<128x128xf32>, vector<8x128xf32> -> vector<8x128xf32>
    %c0_65 = arith.constant 0 : index
    %c0_66 = arith.constant 0 : index
    %261 = vector.load %arg8[%c0_65, %c0_66] : memref<1x128xf32, #tpu.memory_space<vmem>>, vector<1x128xf32>
    %262 = vector.broadcast %261 : vector<1x128xf32> to vector<8x128xf32>
    %263 = arith.addf %260, %262 : vector<8x128xf32>
    %c0_67 = arith.constant 0 : index
    %c0_68 = arith.constant 0 : index
    %264 = vector.load %arg9[%c0_67, %c0_68] : memref<8x128xf32, #tpu.memory_space<vmem>>, vector<8x128xf32>
    tpu.vector_store %arg9[%c0_67, %c0_68], %263 {strides = array<i32>} : memref<8x128xf32, #tpu.memory_space<vmem>>, vector<8x128xf32>,
    %c0_69 = arith.constant 0 : index
    %c0_70 = arith.constant 0 : index
    %265 = vector.load %arg10[%c0_69, %c0_70] : memref<8x128xf32, #tpu.memory_space<vmem>>, vector<8x128xf32>
    tpu.vector_store %arg10[%c0_69, %c0_70], %258 {strides = array<i32>} : memref<8x128xf32, #tpu.memory_space<vmem>>, vector<8x128xf32>,
    %c0_71 = arith.constant 0 : index
    %c0_72 = arith.constant 0 : index
    %266 = vector.load %arg11[%c0_71, %c0_72] : memref<8x128xf32, #tpu.memory_space<vmem>>, vector<8x128xf32>
    tpu.vector_store %arg11[%c0_71, %c0_72], %256 {strides = array<i32>} : memref<8x128xf32, #tpu.memory_space<vmem>>, vector<8x128xf32>,
    return
  }
  func.func @transform_0(%arg0: i32) -> (i32, i32, i32) {
    %c0_i32 = arith.constant 0 : i32
    %c0_i32_0 = arith.constant 0 : i32
    %c0_i32_1 = arith.constant 0 : i32
    return %c0_i32, %arg0, %c0_i32_0 : i32, i32, i32
  }
  func.func @transform_1(%arg0: i32) -> (i32, i32) {
    %c0_i32 = arith.constant 0 : i32
    %c0_i32_0 = arith.constant 0 : i32
    return %arg0, %c0_i32 : i32, i32
  }
  func.func @transform_2(%arg0: i32) -> (i32, i32) {
    %c0_i32 = arith.constant 0 : i32
    %c0_i32_0 = arith.constant 0 : i32
    return %arg0, %c0_i32 : i32, i32
  }
  func.func @transform_3(%arg0: i32) -> (i32, i32) {
    %c0_i32 = arith.constant 0 : i32
    %c0_i32_0 = arith.constant 0 : i32
    %c0_i32_1 = arith.constant 0 : i32
    return %c0_i32, %c0_i32_0 : i32, i32
  }
  func.func @transform_4(%arg0: i32) -> (i32, i32) {
    %c0_i32 = arith.constant 0 : i32
    %c0_i32_0 = arith.constant 0 : i32
    %c0_i32_1 = arith.constant 0 : i32
    return %c0_i32, %c0_i32_0 : i32, i32
  }
  func.func @transform_5(%arg0: i32) -> (i32, i32) {
    %c0_i32 = arith.constant 0 : i32
    %c0_i32_0 = arith.constant 0 : i32
    %c0_i32_1 = arith.constant 0 : i32
    return %c0_i32, %c0_i32_0 : i32, i32
  }
  func.func @transform_6(%arg0: i32) -> (i32, i32) {
    %c0_i32 = arith.constant 0 : i32
    %c0_i32_0 = arith.constant 0 : i32
    %c0_i32_1 = arith.constant 0 : i32
    return %c0_i32, %c0_i32_0 : i32, i32
  }
  func.func @transform_7(%arg0: i32) -> (i32, i32) {
    %c0_i32 = arith.constant 0 : i32
    %c0_i32_0 = arith.constant 0 : i32
    %c0_i32_1 = arith.constant 0 : i32
    return %c0_i32, %c0_i32_0 : i32, i32
  }
  func.func @transform_8(%arg0: i32) -> (i32, i32) {
    %c0_i32 = arith.constant 0 : i32
    %c0_i32_0 = arith.constant 0 : i32
    return %arg0, %c0_i32 : i32, i32
  }
  func.func @transform_9(%arg0: i32) -> (i32, i32) {
    %c0_i32 = arith.constant 0 : i32
    %c0_i32_0 = arith.constant 0 : i32
    return %arg0, %c0_i32 : i32, i32
  }
  func.func @transform_10(%arg0: i32) -> (i32, i32) {
    %c0_i32 = arith.constant 0 : i32
    %c0_i32_0 = arith.constant 0 : i32
    return %arg0, %c0_i32 : i32, i32
  }
}

</mosaic_0001>

<bundles_post_ra>
// kernel: _forward_impl.1
= control target key start
LH: loop header
LB: loop body
LE: loop exit
PB: predicated region body
PF: predicated region fallthrough
CT: control target
= control target key end

     0   :  { %v2853_v3 = vmov 0.0   ;;  %vm2855_vm0 = vmmov 0   ;;  %s3809_s3 = inlined_call_operand.vmem [shape: f32[128,512], index: 3, kind: input, shape index: {}]   ;;  %s3810_s4 = inlined_call_operand.vmem [shape: f32[128,512], index: 4, kind: input, shape index: {}]   ;;  %s3811_s0 = inlined_call_operand.vmem [shape: f32[8,8,128], index: 0, kind: input, shape index: {}]   ;;  %s3812_s1 = inlined_call_operand.vmem [shape: f32[8,128], index: 1, kind: input, shape index: {}, may-alias: {1,9}]   ;;  %s3813_s5 = inlined_call_operand.vmem [shape: f32[1,512], index: 5, kind: input, shape index: {}]   ;;  %s3814_s2 = inlined_call_operand.vmem [shape: f32[8,128], index: 2, kind: input, shape index: {}, may-alias: {2,10}]   ;;  %s3815_s6 = inlined_call_operand.vmem [shape: f32[128,128], index: 6, kind: input, shape index: {}]   ;;  %s3816_s10 = inlined_call_operand.vmem [shape: f32[8,128], index: 10, kind: output, shape index: {2}, may-alias: {2,10}]   ;;  %s3817_s9 = inlined_call_operand.vmem [shape: f32[8,128], index: 9, kind: output, shape index: {1}, may-alias: {1,9}]   ;;  %s3818_s7 = inlined_call_operand.vmem [shape: f32[1,128], index: 7, kind: input, shape index: {}]   ;;  %s3819_s8 = inlined_call_operand.vmem [shape: f32[8,128], index: 8, kind: output, shape index: {0}]  }
   0x1   :  { %v41_v0 = vld [vmem:[%s3809_s3 + $0x8] sm:$0xff]  ;;  %v43_v2 = vld [vmem:[%s3809_s3 + $0x18] sm:$0xff]  ;;  %190 = vmatprep.mubr.f32.mxu0 %v2853_v3  ;;  %303 = vmatprep.mubr.f32.mxu1 %v2853_v3  ;;  %v40_v6 = vld [vmem:[%s3809_s3] sm:$0xff] }
   0x2   :  { %v45_v1 = vld [vmem:[%s3809_s3 + $0x28] sm:$0xff]  ;;  %v47_v5 = vld [vmem:[%s3809_s3 + $0x38] sm:$0xff]  ;;  %v44_v7 = vld [vmem:[%s3809_s3 + $0x20] sm:$0xff] }
   0x3   :  { %v2058_v4 = vpack.c.bf16 %v45_v1, %v41_v0  ;;  %v2090_v8 = vpack.c.bf16 %v47_v5, %v43_v2  ;;  %v2060_v9 = vpack.c.bf16 %v44_v7, %v40_v6  ;;  %v42_v10 = vld [vmem:[%s3809_s3 + $0x10] sm:$0xff]  ;;  %v49_v12 = vld [vmem:[%s3809_s3 + $0x48] sm:$0xff]  ;;  %v51_v15 = vld [vmem:[%s3809_s3 + $0x58] sm:$0xff] }
   0x4   :  { %v46_v11 = vld [vmem:[%s3809_s3 + $0x30] sm:$0xff]  ;;  %v53_v14 = vld [vmem:[%s3809_s3 + $0x68] sm:$0xff]  ;;  %v55_v16 = vld [vmem:[%s3809_s3 + $0x78] sm:$0xff] }
   0x5   :  { %2059 = vmatprep.subr.bf16.mxu0 %v2058_v4  ;;  %v2092_v13 = vpack.c.bf16 %v46_v11, %v42_v10  ;;  %2091 = vmatprep.subr.bf16.mxu1 %v2090_v8  ;;  %v2062_v17 = vpack.c.bf16 %v53_v14, %v49_v12  ;;  %v2094_v18 = vpack.c.bf16 %v55_v16, %v51_v15  ;;  %v48_v19 = vld [vmem:[%s3809_s3 + $0x40] sm:$0xff]  ;;  %v50_v21 = vld [vmem:[%s3809_s3 + $0x50] sm:$0xff]  ;;  %v57_v24 = vld [vmem:[%s3809_s3 + $0x88] sm:$0xff] }
   0x6   :  { %2061 = vmatpush1.bf16.msra.mxu0 %v2060_v9  ;;  %v52_v20 = vld [vmem:[%s3809_s3 + $0x60] sm:$0xff]  ;;  %v54_v23 = vld [vmem:[%s3809_s3 + $0x70] sm:$0xff]  ;;  %v61_v25 = vld [vmem:[%s3809_s3 + $0xa8] sm:$0xff] }
   0x7   :  { %2093 = vmatpush1.bf16.msra.mxu1 %v2092_v13  ;;  %v2064_v22 = vpack.c.bf16 %v52_v20, %v48_v19  ;;  %2063 = vmatprep.subr.bf16.mxu0 %v2062_v17  ;;  %v2096_v26 = vpack.c.bf16 %v54_v23, %v50_v21  ;;  %v2066_v27 = vpack.c.bf16 %v61_v25, %v57_v24  ;;  %v59_v28 = vld [vmem:[%s3809_s3 + $0x98] sm:$0xff]  ;;  %v56_v30 = vld [vmem:[%s3809_s3 + $0x80] sm:$0xff]  ;;  %v58_v33 = vld [vmem:[%s3809_s3 + $0x90] sm:$0xff] }
   0x8   :  { %2095 = vmatprep.subr.bf16.mxu1 %v2094_v18  ;;  %v63_v29 = vld [vmem:[%s3809_s3 + $0xb8] sm:$0xff]  ;;  %v60_v32 = vld [vmem:[%s3809_s3 + $0xa0] sm:$0xff]  ;;  %v62_v34 = vld [vmem:[%s3809_s3 + $0xb0] sm:$0xff] }
   0x9   :  { %v2098_v31 = vpack.c.bf16 %v63_v29, %v59_v28  ;;  %v2068_v35 = vpack.c.bf16 %v60_v32, %v56_v30  ;;  %v65_v36 = vld [vmem:[%s3809_s3 + $0xc8] sm:$0xff]  ;;  %v67_v38 = vld [vmem:[%s3809_s3 + $0xd8] sm:$0xff]  ;;  %v2100_v39 = vpack.c.bf16 %v62_v34, %v58_v33  ;;  %v64_v42 = vld [vmem:[%s3809_s3 + $0xc0] sm:$0xff] }
   0xa   :  { %2065 = vmatpush1.bf16.msra.mxu0 %v2064_v22  ;;  %v69_v37 = vld [vmem:[%s3809_s3 + $0xe8] sm:$0xff]  ;;  %v71_v41 = vld [vmem:[%s3809_s3 + $0xf8] sm:$0xff]  ;;  %v68_v43 = vld [vmem:[%s3809_s3 + $0xe0] sm:$0xff] }
   0xb   :  { %2097 = vmatpush1.bf16.msra.mxu1 %v2096_v26  ;;  %2067 = vmatprep.subr.bf16.mxu0 %v2066_v27  ;;  %v2070_v40 = vpack.c.bf16 %v69_v37, %v65_v36  ;;  %v2102_v44 = vpack.c.bf16 %v71_v41, %v67_v38  ;;  %v66_v45 = vld [vmem:[%s3809_s3 + $0xd0] sm:$0xff]  ;;  %v73_v47 = vld [vmem:[%s3809_s3 + $0x108] sm:$0xff]  ;;  %v75_v49 = vld [vmem:[%s3809_s3 + $0x118] sm:$0xff]  ;;  %v2072_v51 = vpack.c.bf16 %v68_v43, %v64_v42 }
   0xc   :  { %2099 = vmatprep.subr.bf16.mxu1 %v2098_v31  ;;  %v70_v46 = vld [vmem:[%s3809_s3 + $0xf0] sm:$0xff]  ;;  %v77_v48 = vld [vmem:[%s3809_s3 + $0x128] sm:$0xff]  ;;  %v79_v50 = vld [vmem:[%s3809_s3 + $0x138] sm:$0xff] }
   0xd   :  { %v2104_v52 = vpack.c.bf16 %v70_v46, %v66_v45  ;;  %v2074_v53 = vpack.c.bf16 %v77_v48, %v73_v47  ;;  %v72_v54 = vld [vmem:[%s3809_s3 + $0x100] sm:$0xff]  ;;  %v74_v56 = vld [vmem:[%s3809_s3 + $0x110] sm:$0xff]  ;;  %v2106_v57 = vpack.c.bf16 %v79_v50, %v75_v49  ;;  %v81_v59 = vld [vmem:[%s3809_s3 + $0x148] sm:$0xff] }
   0xe   :  { %2069 = vmatpush1.bf16.msra.mxu0 %v2068_v35  ;;  %v76_v55 = vld [vmem:[%s3809_s3 + $0x120] sm:$0xff]  ;;  %v78_v58 = vld [vmem:[%s3809_s3 + $0x130] sm:$0xff]  ;;  %v85_v60 = vld [vmem:[%s3809_s3 + $0x168] sm:$0xff] }
   0xf   :  { %2101 = vmatpush1.bf16.msra.mxu1 %v2100_v39  ;;  %2071 = vmatprep.subr.bf16.mxu0 %v2070_v40  ;;  %v83_v61 = vld [vmem:[%s3809_s3 + $0x158] sm:$0xff]  ;;  %v2076_v63 = vpack.c.bf16 %v76_v55, %v72_v54  ;;  %v2108_v0 = vpack.c.bf16 %v78_v58, %v74_v56  ;;  %v2078_v1 = vpack.c.bf16 %v85_v60, %v81_v59  ;;  %v80_v2 = vld [vmem:[%s3809_s3 + $0x140] sm:$0xff]  ;;  %v82_v5 = vld [vmem:[%s3809_s3 + $0x150] sm:$0xff] }
  0x10   :  { %2103 = vmatprep.subr.bf16.mxu1 %v2102_v44  ;;  %v87_v62 = vld [vmem:[%s3809_s3 + $0x178] sm:$0xff]  ;;  %v84_v4 = vld [vmem:[%s3809_s3 + $0x160] sm:$0xff]  ;;  %v86_v7 = vld [vmem:[%s3809_s3 + $0x170] sm:$0xff] }
  0x11   :  { %v2110_v6 = vpack.c.bf16 %v87_v62, %v83_v61  ;;  %v89_v8 = vld [vmem:[%s3809_s3 + $0x188] sm:$0xff]  ;;  %v91_v10 = vld [vmem:[%s3809_s3 + $0x198] sm:$0xff]  ;;  %v2080_v12 = vpack.c.bf16 %v84_v4, %v80_v2  ;;  %v2112_v13 = vpack.c.bf16 %v86_v7, %v82_v5  ;;  %v88_v15 = vld [vmem:[%s3809_s3 + $0x180] sm:$0xff] }
  0x12   :  { %2073 = vmatpush1.bf16.msra.mxu0 %v2072_v51  ;;  %v93_v9 = vld [vmem:[%s3809_s3 + $0x1a8] sm:$0xff]  ;;  %v95_v11 = vld [vmem:[%s3809_s3 + $0x1b8] sm:$0xff]  ;;  %v92_v16 = vld [vmem:[%s3809_s3 + $0x1a0] sm:$0xff] }
  0x13   :  { %2105 = vmatpush1.bf16.msra.mxu1 %v2104_v52  ;;  %2075 = vmatprep.subr.bf16.mxu0 %v2074_v53  ;;  %v2082_v14 = vpack.c.bf16 %v93_v9, %v89_v8  ;;  %v90_v17 = vld [vmem:[%s3809_s3 + $0x190] sm:$0xff]  ;;  %v2114_v18 = vpack.c.bf16 %v95_v11, %v91_v10  ;;  %v97_v20 = vld [vmem:[%s3809_s3 + $0x1c8] sm:$0xff]  ;;  %v99_v22 = vld [vmem:[%s3809_s3 + $0x1d8] sm:$0xff]  ;;  %v2084_v24 = vpack.c.bf16 %v92_v16, %v88_v15 }
  0x14   :  { %2107 = vmatprep.subr.bf16.mxu1 %v2106_v57  ;;  %v94_v19 = vld [vmem:[%s3809_s3 + $0x1b0] sm:$0xff]  ;;  %v101_v21 = vld [vmem:[%s3809_s3 + $0x1e8] sm:$0xff]  ;;  %v103_v23 = vld [vmem:[%s3809_s3 + $0x1f8] sm:$0xff] }
  0x15   :  { %v2116_v25 = vpack.c.bf16 %v94_v19, %v90_v17  ;;  %v2086_v26 = vpack.c.bf16 %v101_v21, %v97_v20  ;;  %v96_v27 = vld [vmem:[%s3809_s3 + $0x1c0] sm:$0xff]  ;;  %v98_v29 = vld [vmem:[%s3809_s3 + $0x1d0] sm:$0xff]  ;;  %v2118_v30 = vpack.c.bf16 %v103_v23, %v99_v22  ;;  %v385_v32 = vld [vmem:[%s3810_s4 + $0x8] sm:$0xff] }
  0x16   :  { %2077 = vmatpush1.bf16.msra.mxu0 %v2076_v63  ;;  %v100_v28 = vld [vmem:[%s3809_s3 + $0x1e0] sm:$0xff]  ;;  %v102_v31 = vld [vmem:[%s3809_s3 + $0x1f0] sm:$0xff]  ;;  %v389_v33 = vld [vmem:[%s3810_s4 + $0x28] sm:$0xff] }
  0x17   :  { %2109 = vmatpush1.bf16.msra.mxu1 %v2108_v0  ;;  %2079 = vmatprep.subr.bf16.mxu0 %v2078_v1  ;;  %v387_v34 = vld [vmem:[%s3810_s4 + $0x18] sm:$0xff]  ;;  %v2088_v36 = vpack.c.bf16 %v100_v28, %v96_v27  ;;  %v2120_v37 = vpack.c.bf16 %v102_v31, %v98_v29  ;;  %v3117_v38 = vpack.c.bf16 %v389_v33, %v385_v32  ;;  %v384_v39 = vld [vmem:[%s3810_s4] sm:$0xff]  ;;  %v386_v42 = vld [vmem:[%s3810_s4 + $0x10] sm:$0xff] }
  0x18   :  { %2111 = vmatprep.subr.bf16.mxu1 %v2110_v6  ;;  %v391_v35 = vld [vmem:[%s3810_s4 + $0x38] sm:$0xff]  ;;  %v388_v40 = vld [vmem:[%s3810_s4 + $0x20] sm:$0xff]  ;;  %v390_v43 = vld [vmem:[%s3810_s4 + $0x30] sm:$0xff] }
  0x19   :  { %v3125_v41 = vpack.c.bf16 %v391_v35, %v387_v34  ;;  %v393_v44 = vld [vmem:[%s3810_s4 + $0x48] sm:$0xff]  ;;  %v32_v46 = vld [vmem:[%s3811_s0] sm:$0xff]  ;;  %v3142_v47 = vpack.c.bf16 %v388_v40, %v384_v39  ;;  %v395_v48 = vld [vmem:[%s3810_s4 + $0x58] sm:$0xff]  ;;  %v3151_v50 = vpack.c.bf16 %v390_v43, %v386_v42 }
  0x1a   :  { %2081 = vmatpush1.bf16.msra.mxu0 %v2080_v12  ;;  %v397_v45 = vld [vmem:[%s3810_s4 + $0x68] sm:$0xff]  ;;  %v399_v49 = vld [vmem:[%s3810_s4 + $0x78] sm:$0xff]  ;;  %v392_v51 = vld [vmem:[%s3810_s4 + $0x40] sm:$0xff] }
  0x1b   :  { %2113 = vmatpush1.bf16.msra.mxu1 %v2112_v13  ;;  %2083 = vmatprep.subr.bf16.mxu0 %v2082_v14  ;;  %v396_v52 = vld [vmem:[%s3810_s4 + $0x60] sm:$0xff]  ;;  %v3160_v53 = vpack.c.bf16 %v397_v45, %v393_v44  ;;  %v394_v54 = vld [vmem:[%s3810_s4 + $0x50] sm:$0xff]  ;;  %v3168_v56 = vpack.c.bf16 %v399_v49, %v395_v48  ;;  %v401_v57 = vld [vmem:[%s3810_s4 + $0x88] sm:$0xff] }
  0x1c   :  { %2115 = vmatprep.subr.bf16.mxu1 %v2114_v18  ;;  %v398_v55 = vld [vmem:[%s3810_s4 + $0x70] sm:$0xff]  ;;  %v405_v58 = vld [vmem:[%s3810_s4 + $0xa8] sm:$0xff]  ;;  %v3180_v60 = vpack.c.bf16 %v396_v52, %v392_v51  ;;  %v403_v61 = vld [vmem:[%s3810_s4 + $0x98] sm:$0xff] }
  0x1d   :  { %v33_v59 = vld [vmem:[%s3811_s0 + $0x8] sm:$0xff]  ;;  %v407_v62 = vld [vmem:[%s3810_s4 + $0xb8] sm:$0xff]  ;;  %v3190_v63 = vpack.c.bf16 %v398_v55, %v394_v54  ;;  %v400_v0 = vld [vmem:[%s3810_s4 + $0x80] sm:$0xff]  ;;  %v3200_v2 = vpack.c.bf16 %v405_v58, %v401_v57 }
  0x1e   :  { %2085 = vmatpush1.bf16.msra.mxu0 %v2084_v24  ;;  %v404_v1 = vld [vmem:[%s3810_s4 + $0xa0] sm:$0xff]  ;;  %v402_v4 = vld [vmem:[%s3810_s4 + $0x90] sm:$0xff]  ;;  %v3209_v6 = vpack.c.bf16 %v407_v62, %v403_v61  ;;  %v409_v7 = vld [vmem:[%s3810_s4 + $0xc8] sm:$0xff] }
  0x1f   :  { %2117 = vmatpush1.bf16.msra.mxu1 %v2116_v25  ;;  %2087 = vmatprep.subr.bf16.mxu0 %v2086_v26  ;;  %v406_v5 = vld [vmem:[%s3810_s4 + $0xb0] sm:$0xff]  ;;  %v413_v8 = vld [vmem:[%s3810_s4 + $0xe8] sm:$0xff]  ;;  %v3221_v10 = vpack.c.bf16 %v404_v1, %v400_v0  ;;  %v411_v11 = vld [vmem:[%s3810_s4 + $0xd8] sm:$0xff] }
  0x20   :  { %2119 = vmatprep.subr.bf16.mxu1 %v2118_v30  ;;  %v34_v9 = vld [vmem:[%s3811_s0 + $0x10] sm:$0xff]  ;;  %v415_v12 = vld [vmem:[%s3810_s4 + $0xf8] sm:$0xff]  ;;  %v3231_v13 = vpack.c.bf16 %v406_v5, %v402_v4  ;;  %v408_v14 = vld [vmem:[%s3810_s4 + $0xc0] sm:$0xff]  ;;  %v3241_v16 = vpack.c.bf16 %v413_v8, %v409_v7 }
  0x21   :  { %v412_v15 = vld [vmem:[%s3810_s4 + $0xe0] sm:$0xff]  ;;  %v410_v17 = vld [vmem:[%s3810_s4 + $0xd0] sm:$0xff]  ;;  %v3250_v19 = vpack.c.bf16 %v415_v12, %v411_v11  ;;  %v417_v20 = vld [vmem:[%s3810_s4 + $0x108] sm:$0xff] }
  0x22   :  { %2089 = vmatpush1.bf16.msra.mxu0 %v2088_v36  ;;  %v414_v18 = vld [vmem:[%s3810_s4 + $0xf0] sm:$0xff]  ;;  %v421_v21 = vld [vmem:[%s3810_s4 + $0x128] sm:$0xff]  ;;  %v35_v22 = vld [vmem:[%s3811_s0 + $0x18] sm:$0xff]  ;;  %v3262_v23 = vpack.c.bf16 %v412_v15, %v408_v14 }
  0x23   :  { %2121 = vmatpush1.bf16.msra.mxu1 %v2120_v37  ;;  %2123 = vmatprep.subr.bf16.mxu0 %v3117_v38  ;;  %v419_v24 = vld [vmem:[%s3810_s4 + $0x118] sm:$0xff]  ;;  %v3272_v26 = vpack.c.bf16 %v414_v18, %v410_v17  ;;  %v416_v27 = vld [vmem:[%s3810_s4 + $0x100] sm:$0xff]  ;;  %v3282_v29 = vpack.c.bf16 %v421_v21, %v417_v20  ;;  %v418_v30 = vld [vmem:[%s3810_s4 + $0x110] sm:$0xff] }
  0x24   :  { %2155 = vmatprep.subr.bf16.mxu1 %v3125_v41  ;;  %v423_v25 = vld [vmem:[%s3810_s4 + $0x138] sm:$0xff]  ;;  %v420_v28 = vld [vmem:[%s3810_s4 + $0x120] sm:$0xff]  ;;  %v422_v31 = vld [vmem:[%s3810_s4 + $0x130] sm:$0xff] }
  0x25   :  { %191 = vmatmul.mubr.f32.vlgmr.msra.gmra.mrb[0].mxu0 %v32_v46  ;;  %v3291_v32 = vpack.c.bf16 %v423_v25, %v419_v24  ;;  %v425_v33 = vld [vmem:[%s3810_s4 + $0x148] sm:$0xff]  ;;  %v36_v35 = vld [vmem:[%s3811_s0 + $0x20] sm:$0xff]  ;;  %v3303_v36 = vpack.c.bf16 %v420_v28, %v416_v27  ;;  %v427_v37 = vld [vmem:[%s3810_s4 + $0x158] sm:$0xff]  ;;  %v3313_v40 = vpack.c.bf16 %v422_v31, %v418_v30  ;;  %v106_v30 = vlaneseq }
  0x26   :  { %304 = vmatmul.mubr.f32.vlgmr.msra.gmra.mrb[0].mxu1 %v32_v46  ;;  %2125 = vmatpush1.bf16.msra.mxu0 %v3142_v47  ;;  %v429_v34 = vld [vmem:[%s3810_s4 + $0x168] sm:$0xff]  ;;  %v431_v39 = vld [vmem:[%s3810_s4 + $0x178] sm:$0xff]  ;;  %v424_v42 = vld [vmem:[%s3810_s4 + $0x140] sm:$0xff] }
  0x27   :  { %2157 = vmatpush1.bf16.msra.mxu1 %v3151_v50  ;;  %196 = vmatprep.mubr.f32.mxu0 %v2853_v3  ;;  %v428_v43 = vld [vmem:[%s3810_s4 + $0x160] sm:$0xff]  ;;  %v3323_v44 = vpack.c.bf16 %v429_v34, %v425_v33  ;;  %v426_v45 = vld [vmem:[%s3810_s4 + $0x150] sm:$0xff]  ;;  %v3332_v48 = vpack.c.bf16 %v431_v39, %v427_v37  ;;  %v433_v49 = vld [vmem:[%s3810_s4 + $0x188] sm:$0xff]  ;;  %v107_v31 = vshrl.u32 %v106_v30, 7 }
  0x28   :  { %309 = vmatprep.mubr.f32.mxu1 %v2853_v3  ;;  %2127 = vmatprep.subr.bf16.mxu0 %v3160_v53  ;;  %v430_v46 = vld [vmem:[%s3810_s4 + $0x170] sm:$0xff]  ;;  %v437_v51 = vld [vmem:[%s3810_s4 + $0x1a8] sm:$0xff]  ;;  %v3344_v54 = vpack.c.bf16 %v428_v43, %v424_v42  ;;  %v435_v55 = vld [vmem:[%s3810_s4 + $0x198] sm:$0xff] }
  0x29   :  { %197 = vmatmul.mubr.f32.gmra.mrb[2].mxu0 %v33_v59  ;;  %2159 = vmatprep.subr.bf16.mxu1 %v3168_v56  ;;  %v37_v52 = vld [vmem:[%s3811_s0 + $0x28] sm:$0xff]  ;;  %v439_v57 = vld [vmem:[%s3810_s4 + $0x1b8] sm:$0xff]  ;;  %v3354_v58 = vpack.c.bf16 %v430_v46, %v426_v45  ;;  %v436_v61 = vld [vmem:[%s3810_s4 + $0x1a0] sm:$0xff]  ;;  %v3364_v62 = vpack.c.bf16 %v437_v51, %v433_v49  ;;  %v108_v33 = vsub.s32 0, %v107_v31  ;;  %v120_v43 = vsub.s32 3, %v107_v31 }
  0x2a   :  { %310 = vmatmul.mubr.f32.gmra.mrb[2].mxu1 %v33_v59  ;;  %2129 = vmatpush1.bf16.msra.mxu0 %v3180_v60  ;;  %v432_v59 = vld [vmem:[%s3810_s4 + $0x180] sm:$0xff]  ;;  %v434_v0 = vld [vmem:[%s3810_s4 + $0x190] sm:$0xff]  ;;  %v3373_v4 = vpack.c.bf16 %v439_v57, %v435_v55  ;;  %v441_v5 = vld [vmem:[%s3810_s4 + $0x1c8] sm:$0xff] }
  0x2b   :  { %2161 = vmatpush1.bf16.msra.mxu1 %v3190_v63  ;;  %202 = vmatprep.mubr.f32.mxu0 %v2853_v3  ;;  %v438_v1 = vld [vmem:[%s3810_s4 + $0x1b0] sm:$0xff]  ;;  %v445_v7 = vld [vmem:[%s3810_s4 + $0x1e8] sm:$0xff]  ;;  %v443_v11 = vld [vmem:[%s3810_s4 + $0x1d8] sm:$0xff] }
  0x2c   :  { %315 = vmatprep.mubr.f32.mxu1 %v2853_v3  ;;  %2131 = vmatprep.subr.bf16.mxu0 %v3200_v2  ;;  %v38_v8 = vld [vmem:[%s3811_s0 + $0x30] sm:$0xff]  ;;  %v447_v12 = vld [vmem:[%s3810_s4 + $0x1f8] sm:$0xff]  ;;  %v3395_v14 = vpack.c.bf16 %v438_v1, %v434_v0  ;;  %v440_v15 = vld [vmem:[%s3810_s4 + $0x1c0] sm:$0xff]  ;;  %v3405_v18 = vpack.c.bf16 %v445_v7, %v441_v5 }
  0x2d   :  { %203 = vmatmul.mubr.f32.gmra.mrb[4].mxu0 %v34_v9  ;;  %2163 = vmatprep.subr.bf16.mxu1 %v3209_v6  ;;  %v444_v17 = vld [vmem:[%s3810_s4 + $0x1e0] sm:$0xff]  ;;  %v442_v20 = vld [vmem:[%s3810_s4 + $0x1d0] sm:$0xff]  ;;  %v39_v24 = vld [vmem:[%s3811_s0 + $0x38] sm:$0xff] }
  0x2e   :  { %316 = vmatmul.mubr.f32.gmra.mrb[4].mxu1 %v34_v9  ;;  %2133 = vmatpush1.bf16.msra.mxu0 %v3221_v10  ;;  %v3385_v9 = vpack.c.bf16 %v436_v61, %v432_v59  ;;  %v446_v21 = vld [vmem:[%s3810_s4 + $0x1f0] sm:$0xff]  ;;  %v3420_v25 = vpack.c.bf16 %v444_v17, %v440_v15  ;;  %v448_v28 = vld [vmem:[%s3812_s1] sm:$0xff]  ;;  %v116_v61 = vsub.s32 2, %v107_v31 }
  0x2f   :  { %2165 = vmatpush1.bf16.msra.mxu1 %v3231_v13  ;;  %208 = vmatprep.mubr.f32.mxu0 %v2853_v3  ;;  %v3424_v27 = vpack.c.bf16 %v446_v21, %v442_v20  ;;  %v104_v34 = vld [vmem:[%s3813_s5] sm:$0xf] }
  0x30   :  { %321 = vmatprep.mubr.f32.mxu1 %v2853_v3  ;;  %2135 = vmatprep.subr.bf16.mxu0 %v3241_v16  ;;  %v3475_v37 = vrot.slane %v104_v34, %v108_v33  ;;  %v3481_v59 = vrot.slane %v104_v34, %v120_v43  ;;  %v3484_v1 = vrot.slane %v104_v34, %v116_v61  ;;  %v449_v21 = vld [vmem:[%s3814_s2] sm:$0xff] }
  0x31   :  { %209 = vmatmul.mubr.f32.gmra.mrb[6].mxu0 %v35_v22  ;;  %2167 = vmatprep.subr.bf16.mxu1 %v3250_v19 }
  0x32   :  { %322 = vmatmul.mubr.f32.gmra.mrb[6].mxu1 %v35_v22  ;;  %2137 = vmatpush1.bf16.msra.mxu0 %v3262_v23  ;;  %v3414_v22 = vpack.c.bf16 %v447_v12, %v443_v11 }
  0x33   :  { %2169 = vmatpush1.bf16.msra.mxu1 %v3272_v26  ;;  %214 = vmatprep.mubr.f32.mxu0 %v2853_v3 }
  0x34   :  { %327 = vmatprep.mubr.f32.mxu1 %v2853_v3  ;;  %2139 = vmatprep.subr.bf16.mxu0 %v3282_v29 }
  0x35   :  { %215 = vmatmul.mubr.f32.gmra.mrb[8].mxu0 %v36_v35  ;;  %2171 = vmatprep.subr.bf16.mxu1 %v3291_v32 }
  0x36   :  { %328 = vmatmul.mubr.f32.gmra.mrb[8].mxu1 %v36_v35  ;;  %2141 = vmatpush1.bf16.msra.mxu0 %v3303_v36  ;;  %v112_v35 = vsub.s32 1, %v107_v31 }
  0x37   :  { %2173 = vmatpush1.bf16.msra.mxu1 %v3313_v40  ;;  %220 = vmatprep.mubr.f32.mxu0 %v2853_v3 }
  0x38   :  { %333 = vmatprep.mubr.f32.mxu1 %v2853_v3  ;;  %2143 = vmatprep.subr.bf16.mxu0 %v3323_v44  ;;  %v3477_v39 = vrot.slane %v104_v34, %v112_v35 }
  0x39   :  { %221 = vmatmul.mubr.f32.gmra.mrb[10].mxu0 %v37_v52  ;;  %2175 = vmatprep.subr.bf16.mxu1 %v3332_v48 }
  0x3a   :  { %334 = vmatmul.mubr.f32.gmra.mrb[10].mxu1 %v37_v52  ;;  %2145 = vmatpush1.bf16.msra.mxu0 %v3344_v54 }
  0x3b   :  { %2177 = vmatpush1.bf16.msra.mxu1 %v3354_v58  ;;  %226 = vmatprep.mubr.f32.mxu0 %v2853_v3 }
  0x3c   :  { %339 = vmatprep.mubr.f32.mxu1 %v2853_v3  ;;  %2147 = vmatprep.subr.bf16.mxu0 %v3364_v62 }
  0x3d   :  { %227 = vmatmul.mubr.f32.gmra.mrb[12].mxu0 %v38_v8  ;;  %2179 = vmatprep.subr.bf16.mxu1 %v3373_v4 }
  0x3e   :  { %340 = vmatmul.mubr.f32.gmra.mrb[12].mxu1 %v38_v8  ;;  %2149 = vmatpush1.bf16.msra.mxu0 %v3385_v9 }
  0x3f   :  { %2181 = vmatpush1.bf16.msra.mxu1 %v3395_v14  ;;  %232 = vmatprep.mubr.f32.mxu0 %v2853_v3 }
  0x40   :  { %345 = vmatprep.mubr.f32.mxu1 %v2853_v3  ;;  %2151 = vmatprep.subr.bf16.mxu0 %v3405_v18 }
  0x41   :  { %233 = vmatmul.mubr.f32.gmra.mrb[14].mxu0 %v39_v24  ;;  %2183 = vmatprep.subr.bf16.mxu1 %v3414_v22 }
  0x42   :  { %346 = vmatmul.mubr.f32.gmra.mrb[14].mxu1 %v39_v24  ;;  %2153 = vmatpush1.bf16.msra.mxu0 %v3420_v25 }
  0x43   :  { %2185 = vmatpush1.bf16.msra.mxu1 %v3424_v27  ;;  %521 = vmatprep.mubr.f32.mxu0 %v2853_v3 }
  0x44   :  { %592 = vmatprep.mubr.f32.mxu1 %v2853_v3  ;;  %2187 = vmatprep.subr.bf16.mxu0 %v3117_v38 }
  0x45   :  { %522 = vmatmul.mubr.f32.vlgmr.msra.gmra.mrb[0].mxu0 %v448_v28  ;;  %2219 = vmatprep.subr.bf16.mxu1 %v3125_v41 }
  0x46   :  { %593 = vmatmul.mubr.f32.vlgmr.msra.gmra.mrb[0].mxu1 %v448_v28  ;;  %2189 = vmatpush1.bf16.msra.mxu0 %v3142_v47 }
  0x47   :  { %2221 = vmatpush1.bf16.msra.mxu1 %v3151_v50  ;;  %2191 = vmatprep.subr.bf16.mxu0 %v3160_v53 }
  0x48   :  { %2223 = vmatprep.subr.bf16.mxu1 %v3168_v56  ;;  %698 = vmatprep.mubr.f32.mxu0 %v2853_v3 }
  0x49   :  { %769 = vmatprep.mubr.f32.mxu1 %v2853_v3 }
  0x4a   :  { %2193 = vmatpush1.bf16.msra.mxu0 %v3180_v60 }
  0x4b   :  { %2225 = vmatpush1.bf16.msra.mxu1 %v3190_v63  ;;  %2195 = vmatprep.subr.bf16.mxu0 %v3200_v2 }
  0x4c   :  { %2227 = vmatprep.subr.bf16.mxu1 %v3209_v6 }
  0x4e   :  { %2197 = vmatpush1.bf16.msra.mxu0 %v3221_v10 }
  0x4f   :  { %2229 = vmatpush1.bf16.msra.mxu1 %v3231_v13  ;;  %2199 = vmatprep.subr.bf16.mxu0 %v3241_v16 }
  0x50   :  { %2231 = vmatprep.subr.bf16.mxu1 %v3250_v19 }
  0x52   :  { %2201 = vmatpush1.bf16.msra.mxu0 %v3262_v23 }
  0x53   :  { %2233 = vmatpush1.bf16.msra.mxu1 %v3272_v26  ;;  %2203 = vmatprep.subr.bf16.mxu0 %v3282_v29 }
  0x54   :  { %2235 = vmatprep.subr.bf16.mxu1 %v3291_v32 }
  0x56   :  { %2205 = vmatpush1.bf16.msra.mxu0 %v3303_v36 }
  0x57   :  { %2237 = vmatpush1.bf16.msra.mxu1 %v3313_v40  ;;  %2207 = vmatprep.subr.bf16.mxu0 %v3323_v44 }
  0x58   :  { %2239 = vmatprep.subr.bf16.mxu1 %v3332_v48 }
  0x5a   :  { %2209 = vmatpush1.bf16.msra.mxu0 %v3344_v54 }
  0x5b   :  { %2241 = vmatpush1.bf16.msra.mxu1 %v3354_v58  ;;  %2211 = vmatprep.subr.bf16.mxu0 %v3364_v62 }
  0x5c   :  { %2243 = vmatprep.subr.bf16.mxu1 %v3373_v4 }
  0x5e   :  { %2213 = vmatpush1.bf16.msra.mxu0 %v3385_v9 }
  0x5f   :  { %2245 = vmatpush1.bf16.msra.mxu1 %v3395_v14  ;;  %2215 = vmatprep.subr.bf16.mxu0 %v3405_v18 }
  0x60   :  { %2247 = vmatprep.subr.bf16.mxu1 %v3414_v22 }
  0x62   :  { %2217 = vmatpush1.bf16.msra.mxu0 %v3420_v25 }
  0x63   :  { %2249 = vmatpush1.bf16.msra.mxu1 %v3424_v27  ;;  %2251 = vmatprep.subr.bf16.mxu0 %v3117_v38 }
  0x64   :  { %2283 = vmatprep.subr.bf16.mxu1 %v3125_v41 }
 0x118   :  { %v523_v42 = vpop.f32.mrb[0].mxu0 }
 0x119   :  { %v2658_v45 = vadd.f32 %v523_v42, %v3475_v37  ;;  %v594_v46 = vpop.f32.mrb[0].mxu1  ;;  %v525_v49 = vpop.f32.mrb[1].mxu0 }
 0x11a   :  { %v2659_v51 = vadd.f32 %v525_v49, %v3477_v39  ;;  %v596_v52 = vpop.f32.mrb[1].mxu1  ;;  %v2674_v7 = vadd.f32 %v594_v46, %v3484_v1 }
 0x11b   :  { %v1981_v55 = vmul.f32 -1.442695, %v2658_v45  ;;  %v2675_v0 = vadd.f32 %v596_v52, %v3481_v59 }
 0x11c   :  { %v1982_v57 = vmul.f32 -1.442695, %v2659_v51 }
 0x11d   :  { %2725 = vpow2.f32 %v1981_v55  ;;  %v1983_v5 = vmul.f32 -1.442695, %v2675_v0 }
 0x11e   :  { %2727 = vpow2.f32 %v1982_v57 }
 0x11f   :  { %2729 = vpow2.f32 %v1983_v5 }
 0x120   :  { %2731 = vtanh.f32 %v2674_v7 }
 0x127   :  { %v2726_v8 = vpop.eup %2725 }
 0x128   :  { %v2728_v11 = vpop.eup %2727  ;;  %v606_v12 = vadd.f32 1.0, %v2726_v8 }
 0x129   :  { %v612_v15 = vadd.f32 1.0, %v2728_v11  ;;  %v2730_v17 = vpop.eup %2729 }
 0x12a   :  { %2733 = vrcp.f32 %v606_v12  ;;  %v2732_v20 = vpop.eup %2731  ;;  %v619_v31 = vadd.f32 1.0, %v2730_v17 }
 0x12b   :  { %2735 = vrcp.f32 %v612_v15 }
 0x12c   :  { %2737 = vrcp.f32 %v619_v31 }
 0x134   :  { %v2734_v24 = vpop.eup %2733 }
 0x135   :  { %v2736_v28 = vpop.eup %2735  ;;  %v623_v30 = vmul.f32 %v2734_v24, %v2732_v20 }
 0x136   :  { %v622_v33 = vmul.f32 %v2736_v28, %v449_v21  ;;  %v2738_v35 = vpop.eup %2737 }
 0x138   :  { %v3490_v34 = vadd.f32 %v623_v30, %v622_v33 }
 0x13a   :  { %2739 = vtanh.f32 %v3490_v34 }
 0x144   :  { %v2740_v42 = vpop.eup %2739 }
 0x145   :  { %v626_v43 = vmul.f32 %v2740_v42, %v2738_v35 }
 0x147   :  { %699 = vmatmul.mubr.f32.vlgmr.msra.gmra.mrb[2].mxu0 %v626_v43  ;;  %770 = vmatmul.mubr.f32.vlgmr.msra.gmra.mrb[2].mxu1 %v626_v43 }
 0x148   :  { %2253 = vmatpush1.bf16.msra.mxu0 %v3142_v47  ;;  %2285 = vmatpush1.bf16.msra.mxu1 %v3151_v50 }
 0x149   :  { %2255 = vmatprep.subr.bf16.mxu0 %v3160_v53  ;;  %2287 = vmatprep.subr.bf16.mxu1 %v3168_v56 }
 0x14a   :  { %875 = vmatprep.mubr.f32.mxu0 %v2853_v3  ;;  %946 = vmatprep.mubr.f32.mxu1 %v2853_v3 }
 0x14c   :  { %2257 = vmatpush1.bf16.msra.mxu0 %v3180_v60  ;;  %2289 = vmatpush1.bf16.msra.mxu1 %v3190_v63 }
 0x14d   :  { %2259 = vmatprep.subr.bf16.mxu0 %v3200_v2  ;;  %2291 = vmatprep.subr.bf16.mxu1 %v3209_v6 }
 0x150   :  { %2261 = vmatpush1.bf16.msra.mxu0 %v3221_v10  ;;  %2293 = vmatpush1.bf16.msra.mxu1 %v3231_v13 }
 0x151   :  { %2263 = vmatprep.subr.bf16.mxu0 %v3241_v16  ;;  %2295 = vmatprep.subr.bf16.mxu1 %v3250_v19 }
 0x154   :  { %2265 = vmatpush1.bf16.msra.mxu0 %v3262_v23  ;;  %2297 = vmatpush1.bf16.msra.mxu1 %v3272_v26 }
 0x155   :  { %2267 = vmatprep.subr.bf16.mxu0 %v3282_v29  ;;  %2299 = vmatprep.subr.bf16.mxu1 %v3291_v32 }
 0x158   :  { %2269 = vmatpush1.bf16.msra.mxu0 %v3303_v36  ;;  %2301 = vmatpush1.bf16.msra.mxu1 %v3313_v40 }
 0x159   :  { %2271 = vmatprep.subr.bf16.mxu0 %v3323_v44  ;;  %2303 = vmatprep.subr.bf16.mxu1 %v3332_v48 }
 0x15c   :  { %2273 = vmatpush1.bf16.msra.mxu0 %v3344_v54  ;;  %2305 = vmatpush1.bf16.msra.mxu1 %v3354_v58 }
 0x15d   :  { %2275 = vmatprep.subr.bf16.mxu0 %v3364_v62  ;;  %2307 = vmatprep.subr.bf16.mxu1 %v3373_v4 }
 0x160   :  { %2277 = vmatpush1.bf16.msra.mxu0 %v3385_v9  ;;  %2309 = vmatpush1.bf16.msra.mxu1 %v3395_v14 }
 0x161   :  { %2279 = vmatprep.subr.bf16.mxu0 %v3405_v18  ;;  %2311 = vmatprep.subr.bf16.mxu1 %v3414_v22 }
 0x164   :  { %2281 = vmatpush1.bf16.msra.mxu0 %v3420_v25  ;;  %2313 = vmatpush1.bf16.msra.mxu1 %v3424_v27 }
 0x165   :  { %2315 = vmatprep.subr.bf16.mxu0 %v3117_v38  ;;  %2347 = vmatprep.subr.bf16.mxu1 %v3125_v41 }
 0x21a   :  { %v700_v45 = vpop.f32.mrb[2].mxu0  ;;  %v771_v46 = vpop.f32.mrb[2].mxu1 }
 0x21b   :  { %v2660_v49 = vadd.f32 %v700_v45, %v3475_v37  ;;  %v702_v51 = vpop.f32.mrb[3].mxu0  ;;  %v773_v52 = vpop.f32.mrb[3].mxu1  ;;  %v2676_v7 = vadd.f32 %v771_v46, %v3484_v1 }
 0x21c   :  { %v2661_v55 = vadd.f32 %v702_v51, %v3477_v39  ;;  %v2677_v0 = vadd.f32 %v773_v52, %v3481_v59 }
 0x21d   :  { %v1984_v57 = vmul.f32 -1.442695, %v2660_v49 }
 0x21e   :  { %v1985_v61 = vmul.f32 -1.442695, %v2661_v55  ;;  %v1986_v5 = vmul.f32 -1.442695, %v2677_v0 }
 0x21f   :  { %2741 = vpow2.f32 %v1984_v57 }
 0x220   :  { %2743 = vpow2.f32 %v1985_v61 }
 0x221   :  { %2745 = vpow2.f32 %v1986_v5 }
 0x222   :  { %2747 = vtanh.f32 %v2676_v7 }
 0x229   :  { %v2742_v8 = vpop.eup %2741 }
 0x22a   :  { %v2744_v11 = vpop.eup %2743  ;;  %v783_v12 = vadd.f32 1.0, %v2742_v8 }
 0x22b   :  { %v789_v15 = vadd.f32 1.0, %v2744_v11  ;;  %v2746_v17 = vpop.eup %2745 }
 0x22c   :  { %2749 = vrcp.f32 %v783_v12  ;;  %v2748_v20 = vpop.eup %2747  ;;  %v796_v30 = vadd.f32 1.0, %v2746_v17 }
 0x22d   :  { %2751 = vrcp.f32 %v789_v15 }
 0x22e   :  { %2753 = vrcp.f32 %v796_v30 }
 0x236   :  { %v2750_v21 = vpop.eup %2749 }
 0x237   :  { %v2752_v24 = vpop.eup %2751  ;;  %v800_v28 = vmul.f32 %v2750_v21, %v2748_v20 }
 0x238   :  { %v799_v31 = vmul.f32 %v2752_v24, %v3490_v34  ;;  %v2754_v35 = vpop.eup %2753 }
 0x23a   :  { %v3532_v33 = vadd.f32 %v800_v28, %v799_v31 }
 0x23c   :  { %2755 = vtanh.f32 %v3532_v33 }
 0x246   :  { %v2756_v42 = vpop.eup %2755 }
 0x247   :  { %v803_v43 = vmul.f32 %v2756_v42, %v2754_v35 }
 0x249   :  { %876 = vmatmul.mubr.f32.vlgmr.msra.gmra.mrb[4].mxu0 %v803_v43  ;;  %947 = vmatmul.mubr.f32.vlgmr.msra.gmra.mrb[4].mxu1 %v803_v43 }
 0x24a   :  { %2317 = vmatpush1.bf16.msra.mxu0 %v3142_v47  ;;  %2349 = vmatpush1.bf16.msra.mxu1 %v3151_v50 }
 0x24b   :  { %2319 = vmatprep.subr.bf16.mxu0 %v3160_v53  ;;  %2351 = vmatprep.subr.bf16.mxu1 %v3168_v56 }
 0x24c   :  { %1052 = vmatprep.mubr.f32.mxu0 %v2853_v3  ;;  %1123 = vmatprep.mubr.f32.mxu1 %v2853_v3 }
 0x24e   :  { %2321 = vmatpush1.bf16.msra.mxu0 %v3180_v60  ;;  %2353 = vmatpush1.bf16.msra.mxu1 %v3190_v63 }
 0x24f   :  { %2323 = vmatprep.subr.bf16.mxu0 %v3200_v2  ;;  %2355 = vmatprep.subr.bf16.mxu1 %v3209_v6 }
 0x252   :  { %2325 = vmatpush1.bf16.msra.mxu0 %v3221_v10  ;;  %2357 = vmatpush1.bf16.msra.mxu1 %v3231_v13 }
 0x253   :  { %2327 = vmatprep.subr.bf16.mxu0 %v3241_v16  ;;  %2359 = vmatprep.subr.bf16.mxu1 %v3250_v19 }
 0x256   :  { %2329 = vmatpush1.bf16.msra.mxu0 %v3262_v23  ;;  %2361 = vmatpush1.bf16.msra.mxu1 %v3272_v26 }
 0x257   :  { %2331 = vmatprep.subr.bf16.mxu0 %v3282_v29  ;;  %2363 = vmatprep.subr.bf16.mxu1 %v3291_v32 }
 0x25a   :  { %2333 = vmatpush1.bf16.msra.mxu0 %v3303_v36  ;;  %2365 = vmatpush1.bf16.msra.mxu1 %v3313_v40 }
 0x25b   :  { %2335 = vmatprep.subr.bf16.mxu0 %v3323_v44  ;;  %2367 = vmatprep.subr.bf16.mxu1 %v3332_v48 }
 0x25e   :  { %2337 = vmatpush1.bf16.msra.mxu0 %v3344_v54  ;;  %2369 = vmatpush1.bf16.msra.mxu1 %v3354_v58 }
 0x25f   :  { %2339 = vmatprep.subr.bf16.mxu0 %v3364_v62  ;;  %2371 = vmatprep.subr.bf16.mxu1 %v3373_v4 }
 0x262   :  { %2341 = vmatpush1.bf16.msra.mxu0 %v3385_v9  ;;  %2373 = vmatpush1.bf16.msra.mxu1 %v3395_v14 }
 0x263   :  { %2343 = vmatprep.subr.bf16.mxu0 %v3405_v18  ;;  %2375 = vmatprep.subr.bf16.mxu1 %v3414_v22 }
 0x266   :  { %2345 = vmatpush1.bf16.msra.mxu0 %v3420_v25  ;;  %2377 = vmatpush1.bf16.msra.mxu1 %v3424_v27 }
 0x267   :  { %2379 = vmatprep.subr.bf16.mxu0 %v3117_v38  ;;  %2411 = vmatprep.subr.bf16.mxu1 %v3125_v41 }
 0x31c   :  { %v877_v34 = vpop.f32.mrb[4].mxu0  ;;  %v948_v45 = vpop.f32.mrb[4].mxu1 }
 0x31d   :  { %v2662_v46 = vadd.f32 %v877_v34, %v3475_v37  ;;  %v879_v49 = vpop.f32.mrb[5].mxu0  ;;  %v950_v51 = vpop.f32.mrb[5].mxu1  ;;  %v2678_v5 = vadd.f32 %v948_v45, %v3484_v1 }
 0x31e   :  { %v2663_v52 = vadd.f32 %v879_v49, %v3477_v39  ;;  %v2679_v61 = vadd.f32 %v950_v51, %v3481_v59 }
 0x31f   :  { %v1987_v55 = vmul.f32 -1.442695, %v2662_v46 }
 0x320   :  { %v1988_v57 = vmul.f32 -1.442695, %v2663_v52  ;;  %v1989_v0 = vmul.f32 -1.442695, %v2679_v61 }
 0x321   :  { %2757 = vpow2.f32 %v1987_v55 }
 0x322   :  { %2759 = vpow2.f32 %v1988_v57 }
 0x323   :  { %2761 = vpow2.f32 %v1989_v0 }
 0x324   :  { %2763 = vtanh.f32 %v2678_v5 }
 0x32b   :  { %v2758_v7 = vpop.eup %2757 }
 0x32c   :  { %v2760_v8 = vpop.eup %2759  ;;  %v960_v11 = vadd.f32 1.0, %v2758_v7 }
 0x32d   :  { %v966_v12 = vadd.f32 1.0, %v2760_v8  ;;  %v2762_v15 = vpop.eup %2761 }
 0x32e   :  { %2765 = vrcp.f32 %v960_v11  ;;  %v2764_v17 = vpop.eup %2763  ;;  %v973_v28 = vadd.f32 1.0, %v2762_v15 }
 0x32f   :  { %2767 = vrcp.f32 %v966_v12 }
 0x330   :  { %2769 = vrcp.f32 %v973_v28 }
 0x338   :  { %v2766_v20 = vpop.eup %2765 }
 0x339   :  { %v2768_v21 = vpop.eup %2767  ;;  %v977_v24 = vmul.f32 %v2766_v20, %v2764_v17 }
 0x33a   :  { %v976_v30 = vmul.f32 %v2768_v21, %v3532_v33  ;;  %v2770_v35 = vpop.eup %2769 }
 0x33c   :  { %v3574_v31 = vadd.f32 %v977_v24, %v976_v30 }
 0x33e   :  { %2771 = vtanh.f32 %v3574_v31 }
 0x348   :  { %v2772_v42 = vpop.eup %2771 }
 0x349   :  { %v980_v43 = vmul.f32 %v2772_v42, %v2770_v35 }
 0x34b   :  { %1053 = vmatmul.mubr.f32.vlgmr.msra.gmra.mrb[6].mxu0 %v980_v43  ;;  %1124 = vmatmul.mubr.f32.vlgmr.msra.gmra.mrb[6].mxu1 %v980_v43 }
 0x34c   :  { %2381 = vmatpush1.bf16.msra.mxu0 %v3142_v47  ;;  %2413 = vmatpush1.bf16.msra.mxu1 %v3151_v50 }
 0x34d   :  { %2383 = vmatprep.subr.bf16.mxu0 %v3160_v53  ;;  %2415 = vmatprep.subr.bf16.mxu1 %v3168_v56 }
 0x34e   :  { %1229 = vmatprep.mubr.f32.mxu0 %v2853_v3  ;;  %1300 = vmatprep.mubr.f32.mxu1 %v2853_v3 }
 0x350   :  { %2385 = vmatpush1.bf16.msra.mxu0 %v3180_v60  ;;  %2417 = vmatpush1.bf16.msra.mxu1 %v3190_v63 }
 0x351   :  { %2387 = vmatprep.subr.bf16.mxu0 %v3200_v2  ;;  %2419 = vmatprep.subr.bf16.mxu1 %v3209_v6 }
 0x354   :  { %2389 = vmatpush1.bf16.msra.mxu0 %v3221_v10  ;;  %2421 = vmatpush1.bf16.msra.mxu1 %v3231_v13 }
 0x355   :  { %2391 = vmatprep.subr.bf16.mxu0 %v3241_v16  ;;  %2423 = vmatprep.subr.bf16.mxu1 %v3250_v19 }
 0x358   :  { %2393 = vmatpush1.bf16.msra.mxu0 %v3262_v23  ;;  %2425 = vmatpush1.bf16.msra.mxu1 %v3272_v26 }
 0x359   :  { %2395 = vmatprep.subr.bf16.mxu0 %v3282_v29  ;;  %2427 = vmatprep.subr.bf16.mxu1 %v3291_v32 }
 0x35c   :  { %2397 = vmatpush1.bf16.msra.mxu0 %v3303_v36  ;;  %2429 = vmatpush1.bf16.msra.mxu1 %v3313_v40 }
 0x35d   :  { %2399 = vmatprep.subr.bf16.mxu0 %v3323_v44  ;;  %2431 = vmatprep.subr.bf16.mxu1 %v3332_v48 }
 0x360   :  { %2401 = vmatpush1.bf16.msra.mxu0 %v3344_v54  ;;  %2433 = vmatpush1.bf16.msra.mxu1 %v3354_v58 }
 0x361   :  { %2403 = vmatprep.subr.bf16.mxu0 %v3364_v62  ;;  %2435 = vmatprep.subr.bf16.mxu1 %v3373_v4 }
 0x364   :  { %2405 = vmatpush1.bf16.msra.mxu0 %v3385_v9  ;;  %2437 = vmatpush1.bf16.msra.mxu1 %v3395_v14 }
 0x365   :  { %2407 = vmatprep.subr.bf16.mxu0 %v3405_v18  ;;  %2439 = vmatprep.subr.bf16.mxu1 %v3414_v22 }
 0x368   :  { %2409 = vmatpush1.bf16.msra.mxu0 %v3420_v25  ;;  %2441 = vmatpush1.bf16.msra.mxu1 %v3424_v27 }
 0x369   :  { %2443 = vmatprep.subr.bf16.mxu0 %v3117_v38  ;;  %2475 = vmatprep.subr.bf16.mxu1 %v3125_v41 }
 0x41e   :  { %v1054_v33 = vpop.f32.mrb[6].mxu0  ;;  %v1125_v34 = vpop.f32.mrb[6].mxu1 }
 0x41f   :  { %v2664_v45 = vadd.f32 %v1054_v33, %v3475_v37  ;;  %v1056_v46 = vpop.f32.mrb[7].mxu0  ;;  %v1127_v49 = vpop.f32.mrb[7].mxu1  ;;  %v2680_v0 = vadd.f32 %v1125_v34, %v3484_v1 }
 0x420   :  { %v2665_v51 = vadd.f32 %v1056_v46, %v3477_v39  ;;  %v2681_v57 = vadd.f32 %v1127_v49, %v3481_v59 }
 0x421   :  { %v1990_v52 = vmul.f32 -1.442695, %v2664_v45 }
 0x422   :  { %v1991_v55 = vmul.f32 -1.442695, %v2665_v51  ;;  %v1992_v61 = vmul.f32 -1.442695, %v2681_v57 }
 0x423   :  { %2773 = vpow2.f32 %v1990_v52 }
 0x424   :  { %2775 = vpow2.f32 %v1991_v55 }
 0x425   :  { %2777 = vpow2.f32 %v1992_v61 }
 0x426   :  { %2779 = vtanh.f32 %v2680_v0 }
 0x42d   :  { %v2774_v5 = vpop.eup %2773 }
 0x42e   :  { %v2776_v7 = vpop.eup %2775  ;;  %v1137_v8 = vadd.f32 1.0, %v2774_v5 }
 0x42f   :  { %v1143_v11 = vadd.f32 1.0, %v2776_v7  ;;  %v2778_v12 = vpop.eup %2777 }
 0x430   :  { %2781 = vrcp.f32 %v1137_v8  ;;  %v2780_v15 = vpop.eup %2779  ;;  %v1150_v24 = vadd.f32 1.0, %v2778_v12 }
 0x431   :  { %2783 = vrcp.f32 %v1143_v11 }
 0x432   :  { %2785 = vrcp.f32 %v1150_v24 }
 0x43a   :  { %v2782_v17 = vpop.eup %2781 }
 0x43b   :  { %v2784_v20 = vpop.eup %2783  ;;  %v1154_v21 = vmul.f32 %v2782_v17, %v2780_v15 }
 0x43c   :  { %v1153_v28 = vmul.f32 %v2784_v20, %v3574_v31  ;;  %v2786_v35 = vpop.eup %2785 }
 0x43e   :  { %v3616_v30 = vadd.f32 %v1154_v21, %v1153_v28 }
 0x440   :  { %2787 = vtanh.f32 %v3616_v30 }
 0x44a   :  { %v2788_v42 = vpop.eup %2787 }
 0x44b   :  { %v1157_v43 = vmul.f32 %v2788_v42, %v2786_v35 }
 0x44d   :  { %1230 = vmatmul.mubr.f32.vlgmr.msra.gmra.mrb[8].mxu0 %v1157_v43  ;;  %1301 = vmatmul.mubr.f32.vlgmr.msra.gmra.mrb[8].mxu1 %v1157_v43 }
 0x44e   :  { %2445 = vmatpush1.bf16.msra.mxu0 %v3142_v47  ;;  %2477 = vmatpush1.bf16.msra.mxu1 %v3151_v50 }
 0x44f   :  { %2447 = vmatprep.subr.bf16.mxu0 %v3160_v53  ;;  %2479 = vmatprep.subr.bf16.mxu1 %v3168_v56 }
 0x450   :  { %1406 = vmatprep.mubr.f32.mxu0 %v2853_v3  ;;  %1477 = vmatprep.mubr.f32.mxu1 %v2853_v3 }
 0x452   :  { %2449 = vmatpush1.bf16.msra.mxu0 %v3180_v60  ;;  %2481 = vmatpush1.bf16.msra.mxu1 %v3190_v63 }
 0x453   :  { %2451 = vmatprep.subr.bf16.mxu0 %v3200_v2  ;;  %2483 = vmatprep.subr.bf16.mxu1 %v3209_v6 }
 0x456   :  { %2453 = vmatpush1.bf16.msra.mxu0 %v3221_v10  ;;  %2485 = vmatpush1.bf16.msra.mxu1 %v3231_v13 }
 0x457   :  { %2455 = vmatprep.subr.bf16.mxu0 %v3241_v16  ;;  %2487 = vmatprep.subr.bf16.mxu1 %v3250_v19 }
 0x45a   :  { %2457 = vmatpush1.bf16.msra.mxu0 %v3262_v23  ;;  %2489 = vmatpush1.bf16.msra.mxu1 %v3272_v26 }
 0x45b   :  { %2459 = vmatprep.subr.bf16.mxu0 %v3282_v29  ;;  %2491 = vmatprep.subr.bf16.mxu1 %v3291_v32 }
 0x45e   :  { %2461 = vmatpush1.bf16.msra.mxu0 %v3303_v36  ;;  %2493 = vmatpush1.bf16.msra.mxu1 %v3313_v40 }
 0x45f   :  { %2463 = vmatprep.subr.bf16.mxu0 %v3323_v44  ;;  %2495 = vmatprep.subr.bf16.mxu1 %v3332_v48 }
 0x462   :  { %2465 = vmatpush1.bf16.msra.mxu0 %v3344_v54  ;;  %2497 = vmatpush1.bf16.msra.mxu1 %v3354_v58 }
 0x463   :  { %2467 = vmatprep.subr.bf16.mxu0 %v3364_v62  ;;  %2499 = vmatprep.subr.bf16.mxu1 %v3373_v4 }
 0x466   :  { %2469 = vmatpush1.bf16.msra.mxu0 %v3385_v9  ;;  %2501 = vmatpush1.bf16.msra.mxu1 %v3395_v14 }
 0x467   :  { %2471 = vmatprep.subr.bf16.mxu0 %v3405_v18  ;;  %2503 = vmatprep.subr.bf16.mxu1 %v3414_v22 }
 0x46a   :  { %2473 = vmatpush1.bf16.msra.mxu0 %v3420_v25  ;;  %2505 = vmatpush1.bf16.msra.mxu1 %v3424_v27 }
 0x46b   :  { %2507 = vmatprep.subr.bf16.mxu0 %v3117_v38  ;;  %2539 = vmatprep.subr.bf16.mxu1 %v3125_v41 }
 0x520   :  { %v1231_v31 = vpop.f32.mrb[8].mxu0  ;;  %v1302_v33 = vpop.f32.mrb[8].mxu1 }
 0x521   :  { %v2666_v34 = vadd.f32 %v1231_v31, %v3475_v37  ;;  %v1233_v45 = vpop.f32.mrb[9].mxu0  ;;  %v1304_v46 = vpop.f32.mrb[9].mxu1  ;;  %v2682_v61 = vadd.f32 %v1302_v33, %v3484_v1 }
 0x522   :  { %v2667_v49 = vadd.f32 %v1233_v45, %v3477_v39  ;;  %v2683_v55 = vadd.f32 %v1304_v46, %v3481_v59 }
 0x523   :  { %v1993_v51 = vmul.f32 -1.442695, %v2666_v34 }
 0x524   :  { %v1994_v52 = vmul.f32 -1.442695, %v2667_v49  ;;  %v1995_v57 = vmul.f32 -1.442695, %v2683_v55 }
 0x525   :  { %2789 = vpow2.f32 %v1993_v51 }
 0x526   :  { %2791 = vpow2.f32 %v1994_v52 }
 0x527   :  { %2793 = vpow2.f32 %v1995_v57 }
 0x528   :  { %2795 = vtanh.f32 %v2682_v61 }
 0x52f   :  { %v2790_v0 = vpop.eup %2789 }
 0x530   :  { %v2792_v5 = vpop.eup %2791  ;;  %v1314_v7 = vadd.f32 1.0, %v2790_v0 }
 0x531   :  { %v1320_v8 = vadd.f32 1.0, %v2792_v5  ;;  %v2794_v11 = vpop.eup %2793 }
 0x532   :  { %2797 = vrcp.f32 %v1314_v7  ;;  %v2796_v12 = vpop.eup %2795  ;;  %v1327_v21 = vadd.f32 1.0, %v2794_v11 }
 0x533   :  { %2799 = vrcp.f32 %v1320_v8 }
 0x534   :  { %2801 = vrcp.f32 %v1327_v21 }
 0x53c   :  { %v2798_v15 = vpop.eup %2797 }
 0x53d   :  { %v2800_v17 = vpop.eup %2799  ;;  %v1331_v20 = vmul.f32 %v2798_v15, %v2796_v12 }
 0x53e   :  { %v1330_v24 = vmul.f32 %v2800_v17, %v3616_v30  ;;  %v2802_v35 = vpop.eup %2801 }
 0x540   :  { %v3658_v28 = vadd.f32 %v1331_v20, %v1330_v24 }
 0x542   :  { %2803 = vtanh.f32 %v3658_v28 }
 0x54c   :  { %v2804_v42 = vpop.eup %2803 }
 0x54d   :  { %v1334_v43 = vmul.f32 %v2804_v42, %v2802_v35  ;;  %v1869_v42 = vld [vmem:[%s3815_s6 + $0x18] sm:$0xff] }
 0x54f   :  { %1407 = vmatmul.mubr.f32.vlgmr.msra.gmra.mrb[10].mxu0 %v1334_v43  ;;  %1478 = vmatmul.mubr.f32.vlgmr.msra.gmra.mrb[10].mxu1 %v1334_v43 }
 0x550   :  { %2509 = vmatpush1.bf16.msra.mxu0 %v3142_v47  ;;  %2541 = vmatpush1.bf16.msra.mxu1 %v3151_v50 }
 0x551   :  { %2511 = vmatprep.subr.bf16.mxu0 %v3160_v53  ;;  %2543 = vmatprep.subr.bf16.mxu1 %v3168_v56 }
 0x552   :  { %1583 = vmatprep.mubr.f32.mxu0 %v2853_v3  ;;  %1654 = vmatprep.mubr.f32.mxu1 %v2853_v3 }
 0x554   :  { %2513 = vmatpush1.bf16.msra.mxu0 %v3180_v60  ;;  %2545 = vmatpush1.bf16.msra.mxu1 %v3190_v63 }
 0x555   :  { %2515 = vmatprep.subr.bf16.mxu0 %v3200_v2  ;;  %2547 = vmatprep.subr.bf16.mxu1 %v3209_v6 }
 0x558   :  { %2517 = vmatpush1.bf16.msra.mxu0 %v3221_v10  ;;  %2549 = vmatpush1.bf16.msra.mxu1 %v3231_v13 }
 0x559   :  { %2519 = vmatprep.subr.bf16.mxu0 %v3241_v16  ;;  %2551 = vmatprep.subr.bf16.mxu1 %v3250_v19 }
 0x55c   :  { %2521 = vmatpush1.bf16.msra.mxu0 %v3262_v23  ;;  %2553 = vmatpush1.bf16.msra.mxu1 %v3272_v26 }
 0x55d   :  { %2523 = vmatprep.subr.bf16.mxu0 %v3282_v29  ;;  %2555 = vmatprep.subr.bf16.mxu1 %v3291_v32 }
 0x560   :  { %2525 = vmatpush1.bf16.msra.mxu0 %v3303_v36  ;;  %2557 = vmatpush1.bf16.msra.mxu1 %v3313_v40 }
 0x561   :  { %2527 = vmatprep.subr.bf16.mxu0 %v3323_v44  ;;  %2559 = vmatprep.subr.bf16.mxu1 %v3332_v48 }
 0x564   :  { %2529 = vmatpush1.bf16.msra.mxu0 %v3344_v54  ;;  %2561 = vmatpush1.bf16.msra.mxu1 %v3354_v58 }
 0x565   :  { %2531 = vmatprep.subr.bf16.mxu0 %v3364_v62  ;;  %2563 = vmatprep.subr.bf16.mxu1 %v3373_v4 }
 0x568   :  { %2533 = vmatpush1.bf16.msra.mxu0 %v3385_v9  ;;  %2565 = vmatpush1.bf16.msra.mxu1 %v3395_v14 }
 0x569   :  { %2535 = vmatprep.subr.bf16.mxu0 %v3405_v18  ;;  %2567 = vmatprep.subr.bf16.mxu1 %v3414_v22 }
 0x56c   :  { %2537 = vmatpush1.bf16.msra.mxu0 %v3420_v25  ;;  %2569 = vmatpush1.bf16.msra.mxu1 %v3424_v27 }
 0x56d   :  { %2571 = vmatprep.subr.bf16.mxu0 %v3117_v38  ;;  %2603 = vmatprep.subr.bf16.mxu1 %v3125_v41 }
 0x622   :  { %v1408_v30 = vpop.f32.mrb[10].mxu0  ;;  %v1479_v31 = vpop.f32.mrb[10].mxu1 }
 0x623   :  { %v2668_v33 = vadd.f32 %v1408_v30, %v3475_v37  ;;  %v1410_v34 = vpop.f32.mrb[11].mxu0  ;;  %v1481_v45 = vpop.f32.mrb[11].mxu1  ;;  %v2684_v57 = vadd.f32 %v1479_v31, %v3484_v1  ;;  %v1870_v30 = vld [vmem:[%s3815_s6 + $0x20] sm:$0xff]  ;;  %v1871_v31 = vld [vmem:[%s3815_s6 + $0x28] sm:$0xff] }
 0x624   :  { %v2669_v46 = vadd.f32 %v1410_v34, %v3477_v39  ;;  %v2685_v52 = vadd.f32 %v1481_v45, %v3481_v59  ;;  %v1872_v34 = vld [vmem:[%s3815_s6 + $0x30] sm:$0xff]  ;;  %v1873_v45 = vld [vmem:[%s3815_s6 + $0x38] sm:$0xff] }
 0x625   :  { %v1996_v49 = vmul.f32 -1.442695, %v2668_v33  ;;  %v2641_v33 = vpack.c.bf16 %v1871_v31, %v1870_v30 }
 0x626   :  { %v1997_v51 = vmul.f32 -1.442695, %v2669_v46  ;;  %v1998_v55 = vmul.f32 -1.442695, %v2685_v52  ;;  %v2644_v46 = vpack.c.bf16 %v1873_v45, %v1872_v34 }
 0x627   :  { %2805 = vpow2.f32 %v1996_v49  ;;  %v1874_v49 = vld [vmem:[%s3815_s6 + $0x40] sm:$0xff] }
 0x628   :  { %2807 = vpow2.f32 %v1997_v51  ;;  %v1875_v51 = vld [vmem:[%s3815_s6 + $0x48] sm:$0xff] }
 0x629   :  { %2809 = vpow2.f32 %v1998_v55  ;;  %v2647_v52 = vpack.c.bf16 %v1875_v51, %v1874_v49  ;;  %v1876_v55 = vld [vmem:[%s3815_s6 + $0x50] sm:$0xff] }
 0x62a   :  { %2811 = vtanh.f32 %v2684_v57  ;;  %v1877_v57 = vld [vmem:[%s3815_s6 + $0x58] sm:$0xff] }
 0x631   :  { %v2806_v38 = vpop.eup %2805 }
 0x632   :  { %v2808_v61 = vpop.eup %2807  ;;  %v1491_v41 = vadd.f32 1.0, %v2806_v38  ;;  %v1878_v38 = vld [vmem:[%s3815_s6 + $0x60] sm:$0xff] }
 0x633   :  { %v1497_v0 = vadd.f32 1.0, %v2808_v61  ;;  %v2810_v5 = vpop.eup %2809  ;;  %v2650_v61 = vpack.c.bf16 %v1877_v57, %v1876_v55 }
 0x634   :  { %2813 = vrcp.f32 %v1491_v41  ;;  %v2812_v7 = vpop.eup %2811  ;;  %v1504_v15 = vadd.f32 1.0, %v2810_v5  ;;  %v1879_v41 = vld [vmem:[%s3815_s6 + $0x68] sm:$0xff]  ;;  %v1880_v5 = vld [vmem:[%s3815_s6 + $0x70] sm:$0xff] }
 0x635   :  { %2815 = vrcp.f32 %v1497_v0  ;;  %v2653_v0 = vpack.c.bf16 %v1879_v41, %v1878_v38 }
 0x636   :  { %2817 = vrcp.f32 %v1504_v15 }
 0x63e   :  { %v2814_v8 = vpop.eup %2813 }
 0x63f   :  { %v2816_v11 = vpop.eup %2815  ;;  %v1508_v12 = vmul.f32 %v2814_v8, %v2812_v7  ;;  %v1881_v7 = vld [vmem:[%s3815_s6 + $0x78] sm:$0xff] }
 0x640   :  { %v1507_v17 = vmul.f32 %v2816_v11, %v3658_v28  ;;  %v2818_v21 = vpop.eup %2817  ;;  %v1868_v28 = vld [vmem:[%s3815_s6 + $0x10] sm:$0xff]  ;;  %v2656_v8 = vpack.c.bf16 %v1881_v7, %v1880_v5 }
 0x641   :  { %v2638_v43 = vpack.c.bf16 %v1869_v42, %v1868_v28 }
 0x642   :  { %v3700_v20 = vadd.f32 %v1508_v12, %v1507_v17 }
 0x644   :  { %2819 = vtanh.f32 %v3700_v20 }
 0x64e   :  { %v2820_v24 = vpop.eup %2819 }
 0x64f   :  { %v1511_v35 = vmul.f32 %v2820_v24, %v2818_v21 }
 0x651   :  { %1584 = vmatmul.mubr.f32.vlgmr.msra.gmra.mrb[12].mxu0 %v1511_v35  ;;  %1655 = vmatmul.mubr.f32.vlgmr.msra.gmra.mrb[12].mxu1 %v1511_v35 }
 0x652   :  { %2573 = vmatpush1.bf16.msra.mxu0 %v3142_v47  ;;  %2605 = vmatpush1.bf16.msra.mxu1 %v3151_v50 }
 0x653   :  { %2575 = vmatprep.subr.bf16.mxu0 %v3160_v53  ;;  %2607 = vmatprep.subr.bf16.mxu1 %v3168_v56 }
 0x654   :  { %1760 = vmatprep.mubr.f32.mxu0 %v2853_v3  ;;  %1831 = vmatprep.mubr.f32.mxu1 %v2853_v3 }
 0x656   :  { %2577 = vmatpush1.bf16.msra.mxu0 %v3180_v60  ;;  %2609 = vmatpush1.bf16.msra.mxu1 %v3190_v63 }
 0x657   :  { %2579 = vmatprep.subr.bf16.mxu0 %v3200_v2  ;;  %2611 = vmatprep.subr.bf16.mxu1 %v3209_v6 }
 0x65a   :  { %2581 = vmatpush1.bf16.msra.mxu0 %v3221_v10  ;;  %2613 = vmatpush1.bf16.msra.mxu1 %v3231_v13 }
 0x65b   :  { %2583 = vmatprep.subr.bf16.mxu0 %v3241_v16  ;;  %2615 = vmatprep.subr.bf16.mxu1 %v3250_v19 }
 0x65e   :  { %2585 = vmatpush1.bf16.msra.mxu0 %v3262_v23  ;;  %2617 = vmatpush1.bf16.msra.mxu1 %v3272_v26 }
 0x65f   :  { %2587 = vmatprep.subr.bf16.mxu0 %v3282_v29  ;;  %2619 = vmatprep.subr.bf16.mxu1 %v3291_v32 }
 0x662   :  { %2589 = vmatpush1.bf16.msra.mxu0 %v3303_v36  ;;  %2621 = vmatpush1.bf16.msra.mxu1 %v3313_v40 }
 0x663   :  { %2591 = vmatprep.subr.bf16.mxu0 %v3323_v44  ;;  %2623 = vmatprep.subr.bf16.mxu1 %v3332_v48 }
 0x666   :  { %2593 = vmatpush1.bf16.msra.mxu0 %v3344_v54  ;;  %2625 = vmatpush1.bf16.msra.mxu1 %v3354_v58 }
 0x667   :  { %2595 = vmatprep.subr.bf16.mxu0 %v3364_v62  ;;  %2627 = vmatprep.subr.bf16.mxu1 %v3373_v4 }
 0x66a   :  { %2597 = vmatpush1.bf16.msra.mxu0 %v3385_v9  ;;  %2629 = vmatpush1.bf16.msra.mxu1 %v3395_v14 }
 0x66b   :  { %2599 = vmatprep.subr.bf16.mxu0 %v3405_v18  ;;  %2631 = vmatprep.subr.bf16.mxu1 %v3414_v22  ;;  %v1866_v18 = vld [vmem:[%s3815_s6] sm:$0xff]  ;;  %v1867_v22 = vld [vmem:[%s3815_s6 + $0x8] sm:$0xff] }
 0x66e   :  { %2601 = vmatpush1.bf16.msra.mxu0 %v3420_v25  ;;  %2633 = vmatpush1.bf16.msra.mxu1 %v3424_v27  ;;  %v2635_v25 = vpack.c.bf16 %v1867_v22, %v1866_v18  ;;  %v2854_v27 = vmov 0.0|0.0  }
 0x66f   :  { %2634 = vmatprep.subr.bf16.mxu0 %v2854_v27 }
 0x724   :  { %v1585_v47 = vpop.f32.mrb[12].mxu0  ;;  %v1656_v50 = vpop.f32.mrb[12].mxu1 }
 0x725   :  { %v2670_v53 = vadd.f32 %v1585_v47, %v3475_v37  ;;  %v1587_v56 = vpop.f32.mrb[13].mxu0  ;;  %v1658_v60 = vpop.f32.mrb[13].mxu1  ;;  %v2686_v16 = vadd.f32 %v1656_v50, %v3484_v1 }
 0x726   :  { %v2671_v63 = vadd.f32 %v1587_v56, %v3477_v39  ;;  %v2687_v10 = vadd.f32 %v1658_v60, %v3481_v59 }
 0x727   :  { %v1999_v2 = vmul.f32 -1.442695, %v2670_v53 }
 0x728   :  { %v2000_v6 = vmul.f32 -1.442695, %v2671_v63  ;;  %v2001_v13 = vmul.f32 -1.442695, %v2687_v10 }
 0x729   :  { %2821 = vpow2.f32 %v1999_v2 }
 0x72a   :  { %2823 = vpow2.f32 %v2000_v6 }
 0x72b   :  { %2825 = vpow2.f32 %v2001_v13 }
 0x72c   :  { %2827 = vtanh.f32 %v2686_v16 }
 0x733   :  { %v2822_v19 = vpop.eup %2821 }
 0x734   :  { %v2824_v23 = vpop.eup %2823  ;;  %v1668_v26 = vadd.f32 1.0, %v2822_v19 }
 0x735   :  { %v1674_v29 = vadd.f32 1.0, %v2824_v23  ;;  %v2826_v32 = vpop.eup %2825 }
 0x736   :  { %2829 = vrcp.f32 %v1668_v26  ;;  %v2828_v36 = vpop.eup %2827  ;;  %v1681_v54 = vadd.f32 1.0, %v2826_v32  ;;  %v2005_v26 = vld [vmem:[%s3818_s7] ss:$0 sm:$0xff] }
 0x737   :  { %2831 = vrcp.f32 %v1674_v29 }
 0x738   :  { %2833 = vrcp.f32 %v1681_v54 }
 0x740   :  { %v2830_v40 = vpop.eup %2829 }
 0x741   :  { %v2832_v44 = vpop.eup %2831  ;;  %v1685_v48 = vmul.f32 %v2830_v40, %v2828_v36 }
 0x742   :  { %v1684_v58 = vmul.f32 %v2832_v44, %v3700_v20  ;;  %v2834_v4 = vpop.eup %2833 }
 0x744   :  { %v3740_v62 = vadd.f32 %v1685_v48, %v1684_v58 }
 0x746   :  { %2835 = vtanh.f32 %v3740_v62 }
 0x750   :  { %v2836_v9 = vpop.eup %2835 }
 0x751   :  { %v1688_v14 = vmul.f32 %v2836_v9, %v2834_v4 }
 0x753   :  { %1761 = vmatmul.mubr.f32.vlgmr.msra.gmra.mrb[14].mxu0 %v1688_v14  ;;  %1832 = vmatmul.mubr.f32.vlgmr.msra.gmra.mrb[14].mxu1 %v1688_v14 }
 0x754   :  { %2636 = vmatpush3.bf16.msra.mxu0 %v2635_v25  ;;  %2055 = vmatprep.mubr.msk.f32.mxu0 %vm2855_vm0, %v2853_v3 }
 0x755   :  { %2637 = vmatprep.subr.bf16.mxu0 %v2854_v27 }
 0x758   :  { %2639 = vmatpush3.bf16.msra.mxu0 %v2638_v43 }
 0x759   :  { %2640 = vmatprep.subr.bf16.mxu0 %v2854_v27 }
 0x75c   :  { %2642 = vmatpush3.bf16.msra.mxu0 %v2641_v33 }
 0x75d   :  { %2643 = vmatprep.subr.bf16.mxu0 %v2854_v27 }
 0x760   :  { %2645 = vmatpush3.bf16.msra.mxu0 %v2644_v46 }
 0x761   :  { %2646 = vmatprep.subr.bf16.mxu0 %v2854_v27 }
 0x764   :  { %2648 = vmatpush3.bf16.msra.mxu0 %v2647_v52 }
 0x765   :  { %2649 = vmatprep.subr.bf16.mxu0 %v2854_v27 }
 0x768   :  { %2651 = vmatpush3.bf16.msra.mxu0 %v2650_v61 }
 0x769   :  { %2652 = vmatprep.subr.bf16.mxu0 %v2854_v27 }
 0x76c   :  { %2654 = vmatpush3.bf16.msra.mxu0 %v2653_v0 }
 0x76d   :  { %2655 = vmatprep.subr.bf16.mxu0 %v2854_v27 }
 0x770   :  { %2657 = vmatpush3.bf16.msra.mxu0 %v2656_v8 }
 0x826   :  { %v1762_v11 = vpop.f32.mrb[14].mxu0  ;;  %v1833_v12 = vpop.f32.mrb[14].mxu1 }
 0x827   :  { %v2672_v15 = vadd.f32 %v1762_v11, %v3475_v37  ;;  %v1764_v3 = vpop.f32.mrb[15].mxu0  ;;  %v1835_v17 = vpop.f32.mrb[15].mxu1  ;;  %v2688_v50 = vadd.f32 %v1833_v12, %v3484_v1 }
 0x828   :  { %v2673_v20 = vadd.f32 %v1764_v3, %v3477_v39  ;;  %v2689_v35 = vadd.f32 %v1835_v17, %v3481_v59 }
 0x829   :  { %v2002_v21 = vmul.f32 -1.442695, %v2672_v15 }
 0x82a   :  { %v2003_v24 = vmul.f32 -1.442695, %v2673_v20  ;;  %v2004_v47 = vmul.f32 -1.442695, %v2689_v35 }
 0x82b   :  { %2837 = vpow2.f32 %v2002_v21 }
 0x82c   :  { %2839 = vpow2.f32 %v2003_v24 }
 0x82d   :  { %2841 = vpow2.f32 %v2004_v47 }
 0x82e   :  { %2843 = vtanh.f32 %v2688_v50 }
 0x835   :  { %v2838_v53 = vpop.eup %2837 }
 0x836   :  { %v2840_v56 = vpop.eup %2839  ;;  %v1845_v60 = vadd.f32 1.0, %v2838_v53 }
 0x837   :  { %v1851_v63 = vadd.f32 1.0, %v2840_v56  ;;  %v2842_v37 = vpop.eup %2841 }
 0x838   :  { %2845 = vrcp.f32 %v1845_v60  ;;  %v2844_v2 = vpop.eup %2843  ;;  %v1858_v13 = vadd.f32 1.0, %v2842_v37 }
 0x839   :  { %2847 = vrcp.f32 %v1851_v63 }
 0x83a   :  { %2849 = vrcp.f32 %v1858_v13 }
 0x842   :  { %v2846_v39 = vpop.eup %2845 }
 0x843   :  { %v2848_v6 = vpop.eup %2847  ;;  %v1862_v10 = vmul.f32 %v2846_v39, %v2844_v2 }
 0x844   :  { %v1861_v16 = vmul.f32 %v2848_v6, %v3740_v62  ;;  %v2850_v1 = vpop.eup %2849 }
 0x846   :  { %v1863_v59 = vadd.f32 %v1862_v10, %v1861_v16 }
 0x848   :  { %1961 = vst [vmem:[%s3816_s10] sm:$0xff] %v1863_v59  ;;  %2851 = vtanh.f32 %v1863_v59 }
 0x852   :  { %v2852_v19 = vpop.eup %2851 }
 0x853   :  { %v1865_v23 = vmul.f32 %v2852_v19, %v2850_v1 }
 0x855   :  { %2056 = vmatmul.mubr.f32.vlgmr.msra.gmra.mrb[16].mxu0 %v1865_v23  ;;  %1960 = vst [vmem:[%s3817_s9] sm:$0xff] %v1865_v23 }
 0x928   :  { %v1955_v29 = vpop.f32.mrb[16].mxu0 }
 0x929   :  { %v1956_v32 = vadd.f32 %v2005_v26, %v1955_v29  ;;  %v2057_v36 = vpop.f32.mrb[17].mxu0 }
 0x92b   :  { %1959 = vst [vmem:[%s3819_s8] sm:$0xff] %v1956_v32 }

</bundles_post_ra>
